<compile_context>
chip_gen: v5e
topology: v5e:2x2
jax: 0.10.0
libtpu: 0.0.40
codegen_flags: <defaults>
</compile_context>

<pallas_src>
import functools
import math

import jax
import jax.numpy as jnp
from jax import lax
from jax.experimental import pallas as pl
from jax.experimental.pallas import tpu as pltpu


def _round_up(x, m):
    return (x + m - 1) // m * m


def _supcon_tile_kernel(a_ref, c_ref, lab_r_ref, lab_c_ref, mp_r_ref, mp_c_ref,
                        out_ref,
                        m_sc, l_sc, ws_sc, ms_sc,
                        *, inv_temp, loss_scale, n_valid, tm, tn):
    i = pl.program_id(0)          # anchor-row tile
    j = pl.program_id(1)          # contrast-col tile (reduction axis, last)
    last_j = pl.num_programs(1) - 1

    @pl.when(j == 0)
    def _init():
        m_sc[...] = jnp.full_like(m_sc, -jnp.inf)
        l_sc[...] = jnp.zeros_like(l_sc)
        ws_sc[...] = jnp.zeros_like(ws_sc)
        ms_sc[...] = jnp.zeros_like(ms_sc)

    # sim = (A @ C^T) * (1/T): bf16 operands -> f32 accumulation on the MXU,
    # contraction on dim 1 of both operands (no transpose on the [T, D] tile).
    sim = lax.dot_general(
        a_ref[...], c_ref[...],
        dimension_numbers=(((1,), (1,)), ((), ())),
        preferred_element_type=jnp.float32) * inv_temp                 # [TM, TN]

    # Global element indices of this tile (diagonal exclusion + padded cols).
    row_ids = i * tm + lax.broadcasted_iota(jnp.int32, (tm, tn), 0)
    col_ids = j * tn + lax.broadcasted_iota(jnp.int32, (tm, tn), 1)
    # TODO(synk): gate the diagonal compare behind an "is diagonal tile" check
    # (only 1/num_col_tiles of tiles touch the diagonal); kept unconditional
    # here — a few VPU ops vs. the exp/matmul cost, and it keeps lowering simple.
    logits_mask = jnp.logical_and(col_ids < n_valid,
                                  row_ids != col_ids).astype(jnp.float32)

    # Positive-pair mask built on the fly: (labels equal) * max_prob_i*max_prob_j.
    eq = (lab_r_ref[...] == lab_c_ref[...]).astype(jnp.float32)        # [TM,TN]
    score = mp_r_ref[...] * mp_c_ref[...]                              # [TM,TN]
    pos_mask = eq * score * logits_mask

    # Online softmax denominator (running max / rescaled exp-sum).
    m_prev = m_sc[...]
    m_new = jnp.maximum(m_prev, jnp.max(sim, axis=1, keepdims=True))
    alpha = jnp.exp(m_prev - m_new)
    l_sc[...] = alpha * l_sc[...] + jnp.sum(jnp.exp(sim - m_new) * logits_mask,
                                            axis=1, keepdims=True)
    m_sc[...] = m_new

    # Running masked sums (linear in sim -> no rescaling needed).
    ws_sc[...] += jnp.sum(pos_mask * sim, axis=1, keepdims=True)
    ms_sc[...] += jnp.sum(pos_mask, axis=1, keepdims=True)

    @pl.when(j == last_j)
    def _finalize():
        ms = ms_sc[...]
        # log sum_k exp(sim_k) * logits_mask_k  (shift-invariant reconstruction)
        log_denom = m_sc[...] + jnp.log(l_sc[...])
        safe_ms = jnp.where(ms > 0.0, ms, 1.0)
        mlpp = (ws_sc[...] - ms * log_denom) * pl.reciprocal(safe_ms, approx=True)
        row_ids_1 = i * tm + lax.broadcasted_iota(jnp.int32, (tm, 1), 0)
        valid = jnp.logical_and(row_ids_1 < n_valid, ms > 0.0)
        # Rows with no positives are zeroed (PyTorch original would NaN there).
        out_ref[...] = jnp.where(valid, -loss_scale * mlpp, 0.0)


def soft_sup_con_loss(features, max_probs, labels,
                      temperature=0.07, base_temperature=0.07,
                      contrast_mode='all', reduction='mean',
                      block_m=128, block_n=128, matmul_dtype=jnp.bfloat16):
    """JAX/Pallas equivalent of SoftSupConLoss.forward (labels path, mode='all')."""
    assert features.ndim == 3, "`features` must be [bsz, n_views, dim]"
    assert contrast_mode == 'all' and reduction == 'mean'
    bsz, n_views, dim = features.shape
    n = n_views * bsz

    # contrast_feature = torch.cat(torch.unbind(features, dim=1), dim=0)  -> [N, D]
    contrast = jnp.concatenate([features[:, v, :] for v in range(n_views)], axis=0)

    # Pad rows to the tile size and D (lanes) to a multiple of 128; bf16 for MXU.
    n_pad = _round_up(n, math.lcm(block_m, block_n))
    d_pad = _round_up(dim, 128)
    feat = jnp.zeros((n_pad, d_pad), dtype=matmul_dtype)
    feat = feat.at[:n, :dim].set(contrast.astype(matmul_dtype))

    # Per-anchor labels / max_probs in contrast order (view-major tiling).
    labels_flat = jnp.tile(labels.reshape(-1).astype(jnp.int32), n_views)    # [N]
    mp_flat = jnp.tile(max_probs.reshape(-1).astype(jnp.float32), n_views)   # [N]
    lab_pad = jnp.full((n_pad,), -1, dtype=jnp.int32).at[:n].set(labels_flat)
    mp_pad = jnp.zeros((n_pad,), dtype=jnp.float32).at[:n].set(mp_flat)
    lab_col = lab_pad.reshape(n_pad, 1)    # [N_pad, 1]  (anchor-row orientation)
    lab_row = lab_pad.reshape(1, n_pad)    # [1, N_pad]  (contrast-col orientation)
    mp_col = mp_pad.reshape(n_pad, 1)
    mp_row = mp_pad.reshape(1, n_pad)

    grid = (n_pad // block_m, n_pad // block_n)

    kernel = functools.partial(
        _supcon_tile_kernel,
        inv_temp=float(1.0 / temperature),
        loss_scale=float(temperature / base_temperature),
        n_valid=n, tm=block_m, tn=block_n)

    per_row = pl.pallas_call(
        kernel,
        out_shape=jax.ShapeDtypeStruct((n_pad, 1), jnp.float32),
        grid_spec=pltpu.PrefetchScalarGridSpec(
            num_scalar_prefetch=0,
            grid=grid,
            in_specs=[
                pl.BlockSpec((block_m, d_pad), lambda i, j: (i, 0)),   # anchor rows
                pl.BlockSpec((block_n, d_pad), lambda i, j: (j, 0)),   # contrast cols
                pl.BlockSpec((block_m, 1), lambda i, j: (i, 0)),       # labels (rows)
                pl.BlockSpec((1, block_n), lambda i, j: (0, j)),       # labels (cols)
                pl.BlockSpec((block_m, 1), lambda i, j: (i, 0)),       # max_probs (rows)
                pl.BlockSpec((1, block_n), lambda i, j: (0, j)),       # max_probs (cols)
            ],
            out_specs=pl.BlockSpec((block_m, 1), lambda i, j: (i, 0)),
            scratch_shapes=[pltpu.VMEM((block_m, 1), jnp.float32)] * 4,
        ),
        compiler_params=pltpu.CompilerParams(
            dimension_semantics=("parallel", "arbitrary"),
            vmem_limit_bytes=32 * 1024 * 1024),
    )(feat, feat, lab_col, lab_row, mp_col, mp_row)

    # loss.view(anchor_count, batch_size).mean() == mean over all N real anchors.
    # (Tiny O(N) reduction left to XLA; padded rows wrote 0.)
    return jnp.sum(per_row) / n


def _reference_loss(features, max_probs, labels, temperature=0.07,
                    base_temperature=0.07, matmul_dtype=jnp.float32):
    """Pure-JAX reference (PyTorch semantics) for verification."""
    bsz, n_views, _ = features.shape
    labels = labels.reshape(-1, 1)
    mask = (labels == labels.T).astype(jnp.float32)
    mp = max_probs.reshape(-1, 1).astype(jnp.float32)
    mask = mask * (mp @ mp.T)
    contrast = jnp.concatenate([features[:, v] for v in range(n_views)], 0)
    cf = contrast.astype(matmul_dtype)
    adc = jnp.dot(cf, cf, precision=None,
                  preferred_element_type=jnp.float32) if False else \
          jnp.matmul(cf, cf.T, preferred_element_type=jnp.float32)
    adc = adc / temperature
    logits = adc - jnp.max(adc, axis=1, keepdims=True)
    n = n_views * bsz
    mask = jnp.tile(mask, (n_views, n_views))
    logits_mask = 1.0 - jnp.eye(n, dtype=jnp.float32)
    mask = mask * logits_mask
    exp_logits = jnp.exp(logits) * logits_mask
    log_prob = logits - jnp.log(exp_logits.sum(1, keepdims=True))
    mlpp = (mask * log_prob).sum(1) / mask.sum(1)
    loss = -(temperature / base_temperature) * mlpp
    return loss.mean()


if __name__ == "__main__":
    key = jax.random.PRNGKey(0)
    k1, k2, k3 = jax.random.split(key, 3)

    bsz, n_views, dim = 8, 2, 32
    feats = jax.random.normal(k1, (bsz, n_views, dim), dtype=jnp.float32)
    feats = feats / jnp.linalg.norm(feats, axis=-1, keepdims=True)  # normalized embeddings
    labels = jax.random.randint(k2, (bsz,), 0, 4, dtype=jnp.int32)
    max_probs = jax.random.uniform(k3, (bsz,), dtype=jnp.float32, minval=0.5, maxval=1.0)

    loss = soft_sup_con_loss(feats, max_probs, labels)
    loss = jax.block_until_ready(loss)

    # Strict check vs a reference whose matmul also uses bf16 operands
    # (isolates kernel mechanics: tiling, online softmax, in-kernel mask).
    ref_bf16 = _reference_loss(feats, max_probs, labels, matmul_dtype=jnp.bfloat16)
    # Loose sanity check vs the pure-f32 PyTorch-equivalent reference
    # (bounds the bf16-matmul quantization of the design choice).
    ref_f32 = _reference_loss(feats, max_probs, labels, matmul_dtype=jnp.float32)

    assert jnp.allclose(loss, ref_bf16, rtol=2e-2, atol=2e-2), (loss, ref_bf16)
    assert jnp.allclose(loss, ref_f32, rtol=1e-1, atol=1e-1), (loss, ref_f32)

    print("KERNEL_OK")
</pallas_src>

<mosaic_0001>
module attributes {stable_mosaic.version = 11 : i64} {
  func.func @_supcon_tile_kernel(%arg0: i32, %arg1: i32, %arg2: memref<128x128xbf16, #tpu.memory_space<vmem>>, %arg3: memref<128x128xbf16, #tpu.memory_space<vmem>>, %arg4: memref<128x1xi32, #tpu.memory_space<vmem>>, %arg5: memref<1x128xi32, #tpu.memory_space<vmem>>, %arg6: memref<128x1xf32, #tpu.memory_space<vmem>>, %arg7: memref<1x128xf32, #tpu.memory_space<vmem>>, %arg8: memref<128x1xf32, #tpu.memory_space<vmem>>, %arg9: memref<128x1xf32, #tpu.memory_space<vmem>>, %arg10: memref<128x1xf32, #tpu.memory_space<vmem>>, %arg11: memref<128x1xf32, #tpu.memory_space<vmem>>, %arg12: memref<128x1xf32, #tpu.memory_space<vmem>>) attributes {dimension_semantics = [#tpu.dimension_semantics<parallel>, #tpu.dimension_semantics<arbitrary>], iteration_bounds = array<i64: 1, 1>, scalar_prefetch = 0 : i64, scratch_operands = 4 : i64, tpu.core_type = #tpu.core_type<tc>, window_params = [{transform_indices = @transform_0, window_bounds = array<i64: 128, 128>}, {transform_indices = @transform_1, window_bounds = array<i64: 128, 128>}, {transform_indices = @transform_2, window_bounds = array<i64: 128, 1>}, {transform_indices = @transform_3, window_bounds = array<i64: 1, 128>}, {transform_indices = @transform_4, window_bounds = array<i64: 128, 1>}, {transform_indices = @transform_5, window_bounds = array<i64: 1, 128>}, {transform_indices = @transform_6, window_bounds = array<i64: 128, 1>}]} {
    %c0_i32 = arith.constant 0 : i32
    %0 = arith.cmpi eq, %arg1, %c0_i32 : i32
    %1 = arith.extui %0 : i1 to i32
    %c0_i32_0 = arith.constant 0 : i32
    %2 = arith.cmpi ne, %1, %c0_i32_0 : i32
    scf.if %2 {
      %cst_36 = arith.constant 0xFF800000 : f32
      %67 = vector.broadcast %cst_36 : f32 to vector<128x1xf32>
      %c0_37 = arith.constant 0 : index
      %c0_38 = arith.constant 0 : index
      %68 = vector.load %arg9[%c0_37, %c0_38] : memref<128x1xf32, #tpu.memory_space<vmem>>, vector<128x1xf32>
      tpu.vector_store %arg9[%c0_37, %c0_38], %67 {strides = array<i32>} : memref<128x1xf32, #tpu.memory_space<vmem>>, vector<128x1xf32>,
      %cst_39 = arith.constant 0.000000e+00 : f32
      %69 = vector.broadcast %cst_39 : f32 to vector<128x1xf32>
      %c0_40 = arith.constant 0 : index
      %c0_41 = arith.constant 0 : index
      %70 = vector.load %arg10[%c0_40, %c0_41] : memref<128x1xf32, #tpu.memory_space<vmem>>, vector<128x1xf32>
      tpu.vector_store %arg10[%c0_40, %c0_41], %69 {strides = array<i32>} : memref<128x1xf32, #tpu.memory_space<vmem>>, vector<128x1xf32>,
      %cst_42 = arith.constant 0.000000e+00 : f32
      %71 = vector.broadcast %cst_42 : f32 to vector<128x1xf32>
      %c0_43 = arith.constant 0 : index
      %c0_44 = arith.constant 0 : index
      %72 = vector.load %arg11[%c0_43, %c0_44] : memref<128x1xf32, #tpu.memory_space<vmem>>, vector<128x1xf32>
      tpu.vector_store %arg11[%c0_43, %c0_44], %71 {strides = array<i32>} : memref<128x1xf32, #tpu.memory_space<vmem>>, vector<128x1xf32>,
      %cst_45 = arith.constant 0.000000e+00 : f32
      %73 = vector.broadcast %cst_45 : f32 to vector<128x1xf32>
      %c0_46 = arith.constant 0 : index
      %c0_47 = arith.constant 0 : index
      %74 = vector.load %arg12[%c0_46, %c0_47] : memref<128x1xf32, #tpu.memory_space<vmem>>, vector<128x1xf32>
      tpu.vector_store %arg12[%c0_46, %c0_47], %73 {strides = array<i32>} : memref<128x1xf32, #tpu.memory_space<vmem>>, vector<128x1xf32>,
    } else {
    }
    %c0 = arith.constant 0 : index
    %c0_1 = arith.constant 0 : index
    %3 = vector.load %arg2[%c0, %c0_1] : memref<128x128xbf16, #tpu.memory_space<vmem>>, vector<128x128xbf16>
    %c0_2 = arith.constant 0 : index
    %c0_3 = arith.constant 0 : index
    %4 = vector.load %arg3[%c0_2, %c0_3] : memref<128x128xbf16, #tpu.memory_space<vmem>>, vector<128x128xbf16>
    %cst = arith.constant dense<0.000000e+00> : vector<128x128xf32>
    %5 = tpu.matmul %3, %4, %cst {dimension_numbers = #tpu.dot_dimension_numbers<[1], [1], [0], [0], [0, 0, 1, 0], [], []>} : vector<128x128xbf16>, vector<128x128xbf16>, vector<128x128xf32> -> vector<128x128xf32>
    %cst_4 = arith.constant 14.2857141 : f32
    %6 = vector.broadcast %cst_4 : f32 to vector<128x128xf32>
    %7 = arith.mulf %5, %6 : vector<128x128xf32>
    %c128_i32 = arith.constant 128 : i32
    %8 = arith.muli %arg0, %c128_i32 : i32
    %9 = tpu.iota {dimensions = array<i32: 0>} : vector<128x128xi32>
    %10 = vector.broadcast %8 : i32 to vector<128x128xi32>
    %11 = arith.addi %10, %9 : vector<128x128xi32>
    %c128_i32_5 = arith.constant 128 : i32
    %12 = arith.muli %arg1, %c128_i32_5 : i32
    %13 = tpu.iota {dimensions = array<i32: 1>} : vector<128x128xi32>
    %14 = vector.broadcast %12 : i32 to vector<128x128xi32>
    %15 = arith.addi %14, %13 : vector<128x128xi32>
    %c16_i32 = arith.constant 16 : i32
    %16 = vector.broadcast %c16_i32 : i32 to vector<128x128xi32>
    %17 = arith.cmpi slt, %15, %16 : vector<128x128xi32>
    %18 = arith.cmpi ne, %11, %15 : vector<128x128xi32>
    %19 = arith.andi %17, %18 : vector<128x128xi1>
    %20 = arith.extui %19 : vector<128x128xi1> to vector<128x128xi32>
    %21 = arith.sitofp %20 : vector<128x128xi32> to vector<128x128xf32>
    %c0_6 = arith.constant 0 : index
    %c0_7 = arith.constant 0 : index
    %22 = vector.load %arg4[%c0_6, %c0_7] : memref<128x1xi32, #tpu.memory_space<vmem>>, vector<128x1xi32>
    %c0_8 = arith.constant 0 : index
    %c0_9 = arith.constant 0 : index
    %23 = vector.load %arg5[%c0_8, %c0_9] : memref<1x128xi32, #tpu.memory_space<vmem>>, vector<1x128xi32>
    %24 = vector.broadcast %22 : vector<128x1xi32> to vector<128x128xi32>
    %25 = vector.broadcast %23 : vector<1x128xi32> to vector<128x128xi32>
    %26 = arith.cmpi eq, %24, %25 : vector<128x128xi32>
    %27 = arith.extui %26 : vector<128x128xi1> to vector<128x128xi32>
    %28 = arith.sitofp %27 : vector<128x128xi32> to vector<128x128xf32>
    %c0_10 = arith.constant 0 : index
    %c0_11 = arith.constant 0 : index
    %29 = vector.load %arg6[%c0_10, %c0_11] : memref<128x1xf32, #tpu.memory_space<vmem>>, vector<128x1xf32>
    %c0_12 = arith.constant 0 : index
    %c0_13 = arith.constant 0 : index
    %30 = vector.load %arg7[%c0_12, %c0_13] : memref<1x128xf32, #tpu.memory_space<vmem>>, vector<1x128xf32>
    %31 = vector.broadcast %29 : vector<128x1xf32> to vector<128x128xf32>
    %32 = vector.broadcast %30 : vector<1x128xf32> to vector<128x128xf32>
    %33 = arith.mulf %31, %32 : vector<128x128xf32>
    %34 = arith.mulf %28, %33 : vector<128x128xf32>
    %35 = arith.mulf %34, %21 : vector<128x128xf32>
    %c0_14 = arith.constant 0 : index
    %c0_15 = arith.constant 0 : index
    %36 = vector.load %arg9[%c0_14, %c0_15] : memref<128x1xf32, #tpu.memory_space<vmem>>, vector<128x1xf32>
    %cst_16 = arith.constant dense<0xFF800000> : vector<128xf32>
    %37 = vector.multi_reduction <maximumf>, %7, %cst_16 [1] : vector<128x128xf32> to vector<128xf32>
    %38 = vector.shape_cast %37 : vector<128xf32> to vector<128x1xf32>
    %39 = arith.maximumf %36, %38 : vector<128x1xf32>
    %40 = arith.subf %36, %39 : vector<128x1xf32>
    %41 = math.exp %40 : vector<128x1xf32>
    %c0_17 = arith.constant 0 : index
    %c0_18 = arith.constant 0 : index
    %42 = vector.load %arg10[%c0_17, %c0_18] : memref<128x1xf32, #tpu.memory_space<vmem>>, vector<128x1xf32>
    %43 = arith.mulf %41, %42 : vector<128x1xf32>
    %44 = vector.broadcast %39 : vector<128x1xf32> to vector<128x128xf32>
    %45 = arith.subf %7, %44 : vector<128x128xf32>
    %46 = math.exp %45 : vector<128x128xf32>
    %47 = arith.mulf %46, %21 : vector<128x128xf32>
    %cst_19 = arith.constant dense<0.000000e+00> : vector<128xf32>
    %48 = vector.multi_reduction <add>, %47, %cst_19 [1] : vector<128x128xf32> to vector<128xf32>
    %49 = vector.shape_cast %48 : vector<128xf32> to vector<128x1xf32>
    %50 = arith.addf %43, %49 : vector<128x1xf32>
    %c0_20 = arith.constant 0 : index
    %c0_21 = arith.constant 0 : index
    %51 = vector.load %arg10[%c0_20, %c0_21] : memref<128x1xf32, #tpu.memory_space<vmem>>, vector<128x1xf32>
    tpu.vector_store %arg10[%c0_20, %c0_21], %50 {strides = array<i32>} : memref<128x1xf32, #tpu.memory_space<vmem>>, vector<128x1xf32>,
    %c0_22 = arith.constant 0 : index
    %c0_23 = arith.constant 0 : index
    %52 = vector.load %arg9[%c0_22, %c0_23] : memref<128x1xf32, #tpu.memory_space<vmem>>, vector<128x1xf32>
    tpu.vector_store %arg9[%c0_22, %c0_23], %39 {strides = array<i32>} : memref<128x1xf32, #tpu.memory_space<vmem>>, vector<128x1xf32>,
    %c0_24 = arith.constant 0 : index
    %c0_25 = arith.constant 0 : index
    %53 = vector.load %arg11[%c0_24, %c0_25] : memref<128x1xf32, #tpu.memory_space<vmem>>, vector<128x1xf32>
    %54 = arith.mulf %35, %7 : vector<128x128xf32>
    %cst_26 = arith.constant dense<0.000000e+00> : vector<128xf32>
    %55 = vector.multi_reduction <add>, %54, %cst_26 [1] : vector<128x128xf32> to vector<128xf32>
    %56 = vector.shape_cast %55 : vector<128xf32> to vector<128x1xf32>
    %57 = arith.addf %53, %56 : vector<128x1xf32>
    %c0_27 = arith.constant 0 : index
    %c0_28 = arith.constant 0 : index
    %58 = vector.load %arg11[%c0_27, %c0_28] : memref<128x1xf32, #tpu.memory_space<vmem>>, vector<128x1xf32>
    tpu.vector_store %arg11[%c0_27, %c0_28], %57 {strides = array<i32>} : memref<128x1xf32, #tpu.memory_space<vmem>>, vector<128x1xf32>,
    %c0_29 = arith.constant 0 : index
    %c0_30 = arith.constant 0 : index
    %59 = vector.load %arg12[%c0_29, %c0_30] : memref<128x1xf32, #tpu.memory_space<vmem>>, vector<128x1xf32>
    %cst_31 = arith.constant dense<0.000000e+00> : vector<128xf32>
    %60 = vector.multi_reduction <add>, %35, %cst_31 [1] : vector<128x128xf32> to vector<128xf32>
    %61 = vector.shape_cast %60 : vector<128xf32> to vector<128x1xf32>
    %62 = arith.addf %59, %61 : vector<128x1xf32>
    %c0_32 = arith.constant 0 : index
    %c0_33 = arith.constant 0 : index
    %63 = vector.load %arg12[%c0_32, %c0_33] : memref<128x1xf32, #tpu.memory_space<vmem>>, vector<128x1xf32>
    tpu.vector_store %arg12[%c0_32, %c0_33], %62 {strides = array<i32>} : memref<128x1xf32, #tpu.memory_space<vmem>>, vector<128x1xf32>,
    %c0_i32_34 = arith.constant 0 : i32
    %64 = arith.cmpi eq, %arg1, %c0_i32_34 : i32
    %65 = arith.extui %64 : i1 to i32
    %c0_i32_35 = arith.constant 0 : i32
    %66 = arith.cmpi ne, %65, %c0_i32_35 : i32
    scf.if %66 {
      %c0_36 = arith.constant 0 : index
      %c0_37 = arith.constant 0 : index
      %67 = vector.load %arg12[%c0_36, %c0_37] : memref<128x1xf32, #tpu.memory_space<vmem>>, vector<128x1xf32>
      %c0_38 = arith.constant 0 : index
      %c0_39 = arith.constant 0 : index
      %68 = vector.load %arg9[%c0_38, %c0_39] : memref<128x1xf32, #tpu.memory_space<vmem>>, vector<128x1xf32>
      %c0_40 = arith.constant 0 : index
      %c0_41 = arith.constant 0 : index
      %69 = vector.load %arg10[%c0_40, %c0_41] : memref<128x1xf32, #tpu.memory_space<vmem>>, vector<128x1xf32>
      %70 = math.log %69 : vector<128x1xf32>
      %71 = arith.addf %68, %70 : vector<128x1xf32>
      %cst_42 = arith.constant 0.000000e+00 : f32
      %72 = vector.broadcast %cst_42 : f32 to vector<128x1xf32>
      %73 = arith.cmpf ogt, %67, %72 : vector<128x1xf32>
      %cst_43 = arith.constant 1.000000e+00 : f32
      %74 = vector.broadcast %cst_43 : f32 to vector<128x1xf32>
      %75 = arith.select %73, %67, %74 : vector<128x1xi1>, vector<128x1xf32>
      %c0_44 = arith.constant 0 : index
      %c0_45 = arith.constant 0 : index
      %76 = vector.load %arg11[%c0_44, %c0_45] : memref<128x1xf32, #tpu.memory_space<vmem>>, vector<128x1xf32>
      %77 = arith.mulf %67, %71 : vector<128x1xf32>
      %78 = arith.subf %76, %77 : vector<128x1xf32>
      %79 = tpu.reciprocal %75 {approx = true} : vector<128x1xf32> -> vector<128x1xf32>
      %80 = arith.mulf %78, %79 : vector<128x1xf32>
      %c128_i32_46 = arith.constant 128 : i32
      %81 = arith.muli %arg0, %c128_i32_46 : i32
      %82 = tpu.iota {dimensions = array<i32: 0>} : vector<128x1xi32>
      %83 = vector.broadcast %81 : i32 to vector<128x1xi32>
      %84 = arith.addi %83, %82 : vector<128x1xi32>
      %c16_i32_47 = arith.constant 16 : i32
      %85 = vector.broadcast %c16_i32_47 : i32 to vector<128x1xi32>
      %86 = arith.cmpi slt, %84, %85 : vector<128x1xi32>
      %cst_48 = arith.constant 0.000000e+00 : f32
      %87 = vector.broadcast %cst_48 : f32 to vector<128x1xf32>
      %88 = arith.cmpf ogt, %67, %87 : vector<128x1xf32>
      %89 = arith.andi %86, %88 : vector<128x1xi1>
      %cst_49 = arith.constant -1.000000e+00 : f32
      %90 = vector.broadcast %cst_49 : f32 to vector<128x1xf32>
      %91 = arith.mulf %90, %80 : vector<128x1xf32>
      %cst_50 = arith.constant 0.000000e+00 : f32
      %92 = vector.broadcast %cst_50 : f32 to vector<128x1xf32>
      %93 = arith.select %89, %91, %92 : vector<128x1xi1>, vector<128x1xf32>
      %c0_51 = arith.constant 0 : index
      %c0_52 = arith.constant 0 : index
      %94 = vector.load %arg8[%c0_51, %c0_52] : memref<128x1xf32, #tpu.memory_space<vmem>>, vector<128x1xf32>
      tpu.vector_store %arg8[%c0_51, %c0_52], %93 {strides = array<i32>} : memref<128x1xf32, #tpu.memory_space<vmem>>, vector<128x1xf32>,
    } else {
    }
    return
  }
  func.func @transform_0(%arg0: i32, %arg1: i32) -> (i32, i32) {
    %c0_i32 = arith.constant 0 : i32
    %c0_i32_0 = arith.constant 0 : i32
    return %arg0, %c0_i32 : i32, i32
  }
  func.func @transform_1(%arg0: i32, %arg1: i32) -> (i32, i32) {
    %c0_i32 = arith.constant 0 : i32
    %c0_i32_0 = arith.constant 0 : i32
    return %arg1, %c0_i32 : i32, i32
  }
  func.func @transform_2(%arg0: i32, %arg1: i32) -> (i32, i32) {
    %c0_i32 = arith.constant 0 : i32
    %c0_i32_0 = arith.constant 0 : i32
    return %arg0, %c0_i32 : i32, i32
  }
  func.func @transform_3(%arg0: i32, %arg1: i32) -> (i32, i32) {
    %c0_i32 = arith.constant 0 : i32
    %c0_i32_0 = arith.constant 0 : i32
    return %c0_i32, %arg1 : i32, i32
  }
  func.func @transform_4(%arg0: i32, %arg1: i32) -> (i32, i32) {
    %c0_i32 = arith.constant 0 : i32
    %c0_i32_0 = arith.constant 0 : i32
    return %arg0, %c0_i32 : i32, i32
  }
  func.func @transform_5(%arg0: i32, %arg1: i32) -> (i32, i32) {
    %c0_i32 = arith.constant 0 : i32
    %c0_i32_0 = arith.constant 0 : i32
    return %c0_i32, %arg1 : i32, i32
  }
  func.func @transform_6(%arg0: i32, %arg1: i32) -> (i32, i32) {
    %c0_i32 = arith.constant 0 : i32
    %c0_i32_0 = arith.constant 0 : i32
    return %arg0, %c0_i32 : i32, i32
  }
}

</mosaic_0001>

<bundles_post_ra>
// kernel: tpu_custom_call.1
= control target key start
LH: loop header
LB: loop body
LE: loop exit
PB: predicated region body
PF: predicated region fallthrough
CT: control target
= control target key end

     0   :  { %v1710_v0 = vmov 0   ;;  %v286_v52 = vlaneseq  ;;  %s2737_s2 = inlined_call_operand.vmem [shape: s32[128,1], index: 2, kind: input, shape index: {}]   ;;  %s2738_s1 = inlined_call_operand.vmem [shape: bf16[128,128], index: 1, kind: input, shape index: {}]   ;;  %s2739_s3 = inlined_call_operand.vmem [shape: s32[1,128], index: 3, kind: input, shape index: {}]   ;;  %s2740_s5 = inlined_call_operand.vmem [shape: f32[1,128], index: 5, kind: input, shape index: {}]   ;;  %s2741_s4 = inlined_call_operand.vmem [shape: f32[128,1], index: 4, kind: input, shape index: {}]   ;;  %s2742_s0 = inlined_call_operand.vmem [shape: bf16[128,128], index: 0, kind: input, shape index: {}]   ;;  %s2743_s6 = inlined_call_operand.vmem [shape: f32[128,1], index: 6, kind: output, shape index: {}]  }
   0x1   :  { %1633 = vset.pattern.permute.xlu2 %v1710_v0  ;;  %1632 = vset.pattern.permute.xlu1 %v1710_v0  ;;  %v394_v1 = vld [vmem:[%s2737_s2 + $0x20] sm:$0xff]  ;;  %v392_v2 = vld [vmem:[%s2737_s2 + $0x10] sm:$0xff]  ;;  %v1603_v4 = vld [vmem:[%s2738_s1 + $0x38] sm:$0xff] }
   0x2   :  { %v390_v3 = vld [vmem:[%s2737_s2] sm:$0xff]  ;;  %1631 = vset.pattern.permute.xlu0 %v1710_v0  ;;  %420 = vperm.xlu2 %1633, %v394_v1   ;;  %v395_v5 = vld [vmem:[%s2737_s2 + $0x28] sm:$0xff]  ;;  %v393_v6 = vld [vmem:[%s2737_s2 + $0x18] sm:$0xff]  ;;  %v1895_v55 = vshrl.u32 %v286_v52, 7  ;;  %v1900_v58 = vand.u32 127, %v286_v52 }
   0x3   :  { %414 = vperm.xlu1 %1632, %v392_v2   ;;  %408 = vperm.xlu0 %1631, %v390_v3   ;;  %v391_v7 = vld [vmem:[%s2737_s2 + $0x8] sm:$0xff]  ;;  %v1602_v8 = vld [vmem:[%s2738_s1 + $0x30] sm:$0xff]  ;;  %v398_v9 = vld [vmem:[%s2737_s2 + $0x40] sm:$0xff]  ;;  %v2744_v3 = vmov 0.0  }
   0x4   :  { %220 = vmatpush.bf16.xpose.msra.mxu0 %v1603_v4  ;;  %1604 = vmatpush.bf16.xpose.msra.mxu1 %v1603_v4  ;;  %v397_v10 = vld [vmem:[%s2737_s2 + $0x38] sm:$0xff]  ;;  %v396_v11 = vld [vmem:[%s2737_s2 + $0x30] sm:$0xff]  ;;  %v1601_v12 = vld [vmem:[%s2738_s1 + $0x28] sm:$0xff]  ;;  %v288_v57 = vadd.s32 8, %v1895_v55  ;;  %vm325_vm0 = vcmp.lt.s32.totalorder %v1900_v58, 16  ;;  %vm326_vm4 = vcmp.ne.s32.totalorder %v1895_v55, %v1900_v58  ;;  %v296_v52 = vadd.s32 72, %v1895_v55 }
   0x5   :  { %1605 = vmatpush.bf16.xpose.msra.mxu2 %v1603_v4  ;;  %1606 = vmatpush.bf16.xpose.msra.mxu3 %v1603_v4  ;;  %v401_v13 = vld [vmem:[%s2737_s2 + $0x58] sm:$0xff]  ;;  %v400_v14 = vld [vmem:[%s2737_s2 + $0x50] sm:$0xff]  ;;  %v399_v15 = vld [vmem:[%s2737_s2 + $0x48] sm:$0xff] }
   0x6   :  { %v1600_v16 = vld [vmem:[%s2738_s1 + $0x20] sm:$0xff]  ;;  %v404_v17 = vld [vmem:[%s2737_s2 + $0x70] sm:$0xff]  ;;  %v403_v18 = vld [vmem:[%s2737_s2 + $0x68] sm:$0xff]  ;;  %vm327_vm1 = vcmp.ne.s32.totalorder %v288_v57, %v1900_v58 }
   0x7   :  { %v402_v19 = vld [vmem:[%s2737_s2 + $0x60] sm:$0xff]  ;;  %v1599_v20 = vld [vmem:[%s2738_s1 + $0x18] sm:$0xff]  ;;  %v505_v21 = vld [vmem:[%s2741_s4 + $0x8] sm:$0xff] }
   0x8   :  { %v504_v22 = vld [vmem:[%s2741_s4] sm:$0xff]  ;;  %v405_v23 = vld [vmem:[%s2737_s2 + $0x78] sm:$0xff]  ;;  %v1598_v24 = vld [vmem:[%s2738_s1 + $0x10] sm:$0xff] }
   0x9   :  { %v508_v25 = vld [vmem:[%s2741_s4 + $0x20] sm:$0xff]  ;;  %v507_v26 = vld [vmem:[%s2741_s4 + $0x18] sm:$0xff]  ;;  %v506_v27 = vld [vmem:[%s2741_s4 + $0x10] sm:$0xff] }
   0xa   :  { %423 = vperm.xlu2 %1633, %v395_v5   ;;  %v1597_v28 = vld [vmem:[%s2738_s1 + $0x8] sm:$0xff]  ;;  %v511_v29 = vld [vmem:[%s2741_s4 + $0x38] sm:$0xff]  ;;  %v510_v30 = vld [vmem:[%s2741_s4 + $0x30] sm:$0xff] }
   0xb   :  { %417 = vperm.xlu1 %1632, %v393_v6   ;;  %411 = vperm.xlu0 %1631, %v391_v7   ;;  %v509_v31 = vld [vmem:[%s2741_s4 + $0x28] sm:$0xff]  ;;  %v1596_v32 = vld [vmem:[%s2738_s1] sm:$0xff]  ;;  %v514_v33 = vld [vmem:[%s2741_s4 + $0x50] sm:$0xff] }
   0xc   :  { %221 = vmatpush.bf16.xpose.msra.mxu0 %v1602_v8  ;;  %1607 = vmatpush.bf16.xpose.msra.mxu1 %v1602_v8  ;;  %v513_v34 = vld [vmem:[%s2741_s4 + $0x48] sm:$0xff]  ;;  %v512_v35 = vld [vmem:[%s2741_s4 + $0x40] sm:$0xff]  ;;  %v1590_v37 = vld [vmem:[%s2742_s0 + $0x10] sm:$0xff] }
   0xd   :  { %1608 = vmatpush.bf16.xpose.msra.mxu2 %v1602_v8  ;;  %1609 = vmatpush.bf16.xpose.msra.mxu3 %v1602_v8  ;;  %v1588_v36 = vld [vmem:[%s2742_s0] sm:$0xff]  ;;  %v1594_v39 = vld [vmem:[%s2742_s0 + $0x30] sm:$0xff]  ;;  %v517_v40 = vld [vmem:[%s2741_s4 + $0x68] sm:$0xff] }
   0xe   :  { %v1592_v38 = vld [vmem:[%s2742_s0 + $0x20] sm:$0xff]  ;;  %v515_v42 = vld [vmem:[%s2741_s4 + $0x58] sm:$0xff]  ;;  %v518_v43 = vld [vmem:[%s2741_s4 + $0x70] sm:$0xff] }
   0xf   :  { %v516_v41 = vld [vmem:[%s2741_s4 + $0x60] sm:$0xff]  ;;  %v1589_v44 = vld [vmem:[%s2742_s0 + $0x8] sm:$0xff]  ;;  %v1591_v45 = vld [vmem:[%s2742_s0 + $0x18] sm:$0xff] }
  0x10   :  { %v1593_v46 = vld [vmem:[%s2742_s0 + $0x28] sm:$0xff]  ;;  %v1595_v47 = vld [vmem:[%s2742_s0 + $0x38] sm:$0xff]  ;;  %v1907_v61 = vld [vmem:[%s2739_s3] ss:$0 sm:$0xff] }
  0x11   :  { %v1912_v62 = vld [vmem:[%s2740_s5] ss:$0 sm:$0xff]  ;;  %vm343_vm3 = vmand %vm325_vm0, %vm327_vm1 }
  0x12   :  { %432 = vperm.xlu2 %1633, %v398_v9   ;;  %v1924_v5 = vsel %vm343_vm3, 1.0, %v2744_v3  ;;  %vm342_vm6 = vmand %vm325_vm0, %vm326_vm4 }
  0x13   :  { %429 = vperm.xlu1 %1632, %v397_v10   ;;  %426 = vperm.xlu0 %1631, %v396_v11  }
  0x14   :  { %222 = vmatpush.bf16.xpose.msra.mxu0 %v1601_v12  ;;  %1610 = vmatpush.bf16.xpose.msra.mxu1 %v1601_v12 }
  0x15   :  { %1611 = vmatpush.bf16.xpose.msra.mxu2 %v1601_v12  ;;  %1612 = vmatpush.bf16.xpose.msra.mxu3 %v1601_v12 }
  0x1a   :  { %441 = vperm.xlu2 %1633, %v401_v13   ;;  %v291_v13 = vadd.s32 32, %v1895_v55 }
  0x1b   :  { %438 = vperm.xlu1 %1632, %v400_v14   ;;  %435 = vperm.xlu0 %1631, %v399_v15   ;;  %v290_v14 = vadd.s32 24, %v1895_v55 }
  0x1c   :  { %223 = vmatpush.bf16.xpose.msra.mxu0 %v1600_v16  ;;  %1613 = vmatpush.bf16.xpose.msra.mxu1 %v1600_v16  ;;  %vm330_vm7 = vcmp.ne.s32.totalorder %v291_v13, %v1900_v58 }
  0x1d   :  { %1614 = vmatpush.bf16.xpose.msra.mxu2 %v1600_v16  ;;  %1615 = vmatpush.bf16.xpose.msra.mxu3 %v1600_v16  ;;  %vm329_vm8 = vcmp.ne.s32.totalorder %v290_v14, %v1900_v58  ;;  %vm346_vm11 = vmand %vm325_vm0, %vm330_vm7 }
  0x1e   :  { %vm1966_vm13 = vmand %vm325_vm0, %vm329_vm8 }
  0x22   :  { %450 = vperm.xlu2 %1633, %v404_v17   ;;  %v289_v17 = vadd.s32 16, %v1895_v55 }
  0x23   :  { %447 = vperm.xlu1 %1632, %v403_v18   ;;  %444 = vperm.xlu0 %1631, %v402_v19  }
  0x24   :  { %224 = vmatpush.bf16.xpose.msra.mxu0 %v1599_v20  ;;  %1616 = vmatpush.bf16.xpose.msra.mxu1 %v1599_v20  ;;  %vm328_vm9 = vcmp.ne.s32.totalorder %v289_v17, %v1900_v58 }
  0x25   :  { %1617 = vmatpush.bf16.xpose.msra.mxu2 %v1599_v20  ;;  %1618 = vmatpush.bf16.xpose.msra.mxu3 %v1599_v20  ;;  %v1951_v20 = vsel %vm342_vm6, 1.0, %v2744_v3  ;;  %vm344_vm15 = vmand %vm325_vm0, %vm328_vm9 }
  0x2a   :  { %528 = vperm.xlu2 %1633, %v505_v21  }
  0x2b   :  { %523 = vperm.xlu1 %1632, %v504_v22   ;;  %453 = vperm.xlu0 %1631, %v405_v23  }
  0x2c   :  { %225 = vmatpush.bf16.xpose.msra.mxu0 %v1598_v24  ;;  %1619 = vmatpush.bf16.xpose.msra.mxu1 %v1598_v24 }
  0x2d   :  { %1620 = vmatpush.bf16.xpose.msra.mxu2 %v1598_v24  ;;  %1621 = vmatpush.bf16.xpose.msra.mxu3 %v1598_v24 }
  0x32   :  { %543 = vperm.xlu2 %1633, %v508_v25   ;;  %v294_v25 = vadd.s32 56, %v1895_v55 }
  0x33   :  { %538 = vperm.xlu1 %1632, %v507_v26   ;;  %533 = vperm.xlu0 %1631, %v506_v27   ;;  %v293_v27 = vadd.s32 48, %v1895_v55 }
  0x34   :  { %226 = vmatpush.bf16.xpose.msra.mxu0 %v1597_v28  ;;  %1622 = vmatpush.bf16.xpose.msra.mxu1 %v1597_v28  ;;  %vm333_vm1 = vcmp.ne.s32.totalorder %v294_v25, %v1900_v58 }
  0x35   :  { %1623 = vmatpush.bf16.xpose.msra.mxu2 %v1597_v28  ;;  %1624 = vmatpush.bf16.xpose.msra.mxu3 %v1597_v28  ;;  %vm332_vm3 = vcmp.ne.s32.totalorder %v293_v27, %v1900_v58  ;;  %vm2012_vm6 = vmand %vm325_vm0, %vm333_vm1 }
  0x36   :  { %vm2019_vm7 = vmand %vm325_vm0, %vm332_vm3 }
  0x3a   :  { %558 = vperm.xlu2 %1633, %v511_v29  }
  0x3b   :  { %553 = vperm.xlu1 %1632, %v510_v30   ;;  %548 = vperm.xlu0 %1631, %v509_v31   ;;  %v1978_v31 = vsel %vm346_vm11, 1.0, %v2744_v3  ;;  %vm335_vm11 = vcmp.ne.s32.totalorder %v296_v52, %v1900_v58  ;;  %v299_v52 = vadd.s32 96, %v1895_v55 }
  0x3c   :  { %227 = vmatpush.bf16.xpose.msra.mxu0 %v1596_v32  ;;  %1625 = vmatpush.bf16.xpose.msra.mxu1 %v1596_v32  ;;  %vm351_vm1 = vmand %vm325_vm0, %vm335_vm11 }
  0x3d   :  { %1626 = vmatpush.bf16.xpose.msra.mxu2 %v1596_v32  ;;  %1627 = vmatpush.bf16.xpose.msra.mxu3 %v1596_v32  ;;  %v292_v32 = vadd.s32 40, %v1895_v55 }
  0x42   :  { %573 = vperm.xlu2 %1633, %v514_v33  }
  0x43   :  { %568 = vperm.xlu1 %1632, %v513_v34   ;;  %563 = vperm.xlu0 %1631, %v512_v35  }
  0x44   :  { %228 = vmatmul.bf16.vlgmr.msra.gmra.mxu0 %v1588_v36  ;;  %238 = vmatmul.bf16.vlgmr.msra.gmra.mxu1 %v1590_v37 }
  0x45   :  { %248 = vmatmul.bf16.vlgmr.msra.gmra.mxu2 %v1592_v38  ;;  %258 = vmatmul.bf16.vlgmr.msra.gmra.mxu3 %v1594_v39  ;;  %v1988_v38 = vsel %vm1966_vm13, 1.0, %v2744_v3  ;;  %v1991_v39 = vsel %vm344_vm15, 1.0, %v2744_v3 }
  0x4a   :  { %588 = vperm.xlu2 %1633, %v517_v40  }
  0x4b   :  { %583 = vperm.xlu1 %1632, %v516_v41   ;;  %578 = vperm.xlu0 %1631, %v515_v42  }
  0x53   :  { %593 = vperm.xlu0 %1631, %v518_v43  }
  0x54   :  { %233 = vmatmul.bf16.gmra.mxu0 %v1589_v44  ;;  %243 = vmatmul.bf16.gmra.mxu1 %v1591_v45 }
  0x55   :  { %253 = vmatmul.bf16.gmra.mxu2 %v1593_v46  ;;  %263 = vmatmul.bf16.gmra.mxu3 %v1595_v47 }
  0x5c   :  { %v421_v48 = vpop.permute.xlu2 %420 }
  0x5d   :  { %vm460_vm10 = vcmp.eq.s32.totalorder %v421_v48, %v1907_v61 }
  0x5e   :  { %v1576_v28 = vsel %vm460_vm10, 1.0, %v2744_v3 }
  0x64   :  { %v1889_v49 = vpop.permute.xlu2 %423 }
  0x65   :  { %vm461_vm4 = vcmp.eq.s32.totalorder %v1889_v49, %v1907_v61  ;;  %v297_v49 = vadd.s32 80, %v1895_v55 }
  0x67   :  { %vm336_vm10 = vcmp.ne.s32.totalorder %v297_v49, %v1900_v58 }
  0x6c   :  { %v1891_v50 = vpop.permute.xlu2 %432 }
  0x6d   :  { %vm464_vm15 = vcmp.eq.s32.totalorder %v1891_v50, %v1907_v61 }
  0x6e   :  { %v1580_v50 = vsel %vm464_vm15, 1.0, %v2744_v3 }
  0x74   :  { %v1893_v51 = vpop.permute.xlu2 %441 }
  0x75   :  { %v415_v53 = vpop.permute.xlu1 %414  ;;  %v409_v54 = vpop.permute.xlu0 %408  ;;  %vm467_vm15 = vcmp.eq.s32.totalorder %v1893_v51, %v1907_v61 }
  0x76   :  { %vm456_vm5 = vcmp.eq.s32.totalorder %v409_v54, %v1907_v61  ;;  %vm458_vm12 = vcmp.eq.s32.totalorder %v415_v53, %v1907_v61  ;;  %v1577_v53 = vsel %vm461_vm4, 1.0, %v2744_v3  ;;  %vm338_vm4 = vcmp.ne.s32.totalorder %v299_v52, %v1900_v58 }
  0x77   :  { %v1572_v19 = vsel %vm456_vm5, 1.0, %v2744_v3  ;;  %v1574_v33 = vsel %vm458_vm12, 1.0, %v2744_v3  ;;  %vm331_vm5 = vcmp.ne.s32.totalorder %v292_v32, %v1900_v58 }
  0x78   :  { %vm347_vm9 = vmand %vm325_vm0, %vm331_vm5 }
  0x7c   :  { %v1897_v56 = vpop.permute.xlu2 %450 }
  0x7d   :  { %v418_v59 = vpop.permute.xlu1 %417  ;;  %v412_v60 = vpop.permute.xlu0 %411 }
  0x7e   :  { %vm457_vm2 = vcmp.eq.s32.totalorder %v412_v60, %v1907_v61  ;;  %vm459_vm14 = vcmp.eq.s32.totalorder %v418_v59, %v1907_v61  ;;  %v295_v59 = vadd.s32 64, %v1895_v55 }
  0x7f   :  { %v1573_v4 = vsel %vm457_vm2, 1.0, %v2744_v3  ;;  %v1575_v37 = vsel %vm459_vm14, 1.0, %v2744_v3  ;;  %vm2067_vm14 = vmand %vm325_vm0, %vm336_vm10 }
  0x80   :  { %vm334_vm13 = vcmp.ne.s32.totalorder %v295_v59, %v1900_v58 }
  0x81   :  { %vm350_vm3 = vmand %vm325_vm0, %vm334_vm13 }
  0x84   :  { %v529_v63 = vpop.permute.xlu2 %528 }
  0x85   :  { %v605_v0 = vmul.f32 %v1912_v62, %v529_v63  ;;  %v1918_v1 = vpop.permute.xlu1 %429  ;;  %v1920_v2 = vpop.permute.xlu0 %426 }
  0x86   :  { %vm463_vm2 = vcmp.eq.s32.totalorder %v1918_v1, %v1907_v61  ;;  %vm462_vm8 = vcmp.eq.s32.totalorder %v1920_v2, %v1907_v61  ;;  %v2039_v1 = vsel %vm2012_vm6, 1.0, %v2744_v3  ;;  %vm354_vm6 = vmand %vm325_vm0, %vm338_vm4 }
  0x87   :  { %v621_v6 = vmul.f32 %v1573_v4, %v605_v0  ;;  %v1579_v47 = vsel %vm463_vm2, 1.0, %v2744_v3  ;;  %v1578_v2 = vsel %vm462_vm8, 1.0, %v2744_v3 }
  0x89   :  { %v1927_v7 = vmul.f32 %v1924_v5, %v621_v6  ;;  %v2045_v6 = vsel %vm2019_vm7, 1.0, %v2744_v3  ;;  %vm27_vm7 = vcmask 7168  }
  0x8a   :  { %77 = vst.msk [vmem:[#allocation5 + $0x8] sm:$0xff] %vm27_vm7, %v2744_v3 }
  0x8b   :  { %1135 = vadd.xlane.f32.xlu1 %v1927_v7  ;;  %44 = vst.msk [vmem:[#allocation3] sm:$0xff] %vm27_vm7, %v2744_v3 }
  0x8c   :  { %v544_v12 = vpop.permute.xlu2 %543  ;;  %45 = vst.msk [vmem:[#allocation3 + $0x8] sm:$0xff] %vm27_vm7, %v2744_v3 }
  0x8d   :  { %v1930_v8 = vpop.permute.xlu1 %438  ;;  %v1932_v9 = vpop.permute.xlu0 %435  ;;  %v608_v22 = vmul.f32 %v1912_v62, %v544_v12  ;;  %v2048_v12 = vsel %vm347_vm9, 1.0, %v2744_v3  ;;  %46 = vst.msk [vmem:[#allocation3 + $0x10] sm:$0xff] %vm27_vm7, %v2744_v3 }
  0x8e   :  { %vm466_vm12 = vcmp.eq.s32.totalorder %v1930_v8, %v1907_v61  ;;  %vm465_vm2 = vcmp.eq.s32.totalorder %v1932_v9, %v1907_v61  ;;  %47 = vst.msk [vmem:[#allocation3 + $0x18] sm:$0xff] %vm27_vm7, %v2744_v3 }
  0x8f   :  { %v624_v34 = vmul.f32 %v1576_v28, %v608_v22  ;;  %v1582_v8 = vsel %vm466_vm12, 1.0, %v2744_v3  ;;  %v1581_v27 = vsel %vm465_vm2, 1.0, %v2744_v3  ;;  %v2090_v28 = vsel %vm2067_vm14, 1.0, %v2744_v3  ;;  %48 = vst.msk [vmem:[#allocation3 + $0x20] sm:$0xff] %vm27_vm7, %v2744_v3 }
  0x90   :  { %49 = vst.msk [vmem:[#allocation3 + $0x28] sm:$0xff] %vm27_vm7, %v2744_v3  ;;  %vm470_vm12 = vcmp.eq.s32.totalorder %v1897_v56, %v1907_v61 }
  0x91   :  { %v2005_v44 = vmul.f32 %v1978_v31, %v624_v34  ;;  %50 = vst.msk [vmem:[#allocation3 + $0x30] sm:$0xff] %vm27_vm7, %v2744_v3 }
  0x92   :  { %51 = vst.msk [vmem:[#allocation3 + $0x38] sm:$0xff] %vm27_vm7, %v2744_v3 }
  0x93   :  { %52 = vst.msk [vmem:[#allocation3 + $0x40] sm:$0xff] %vm27_vm7, %v2744_v3 }
  0x94   :  { %v559_v26 = vpop.permute.xlu2 %558  ;;  %53 = vst.msk [vmem:[#allocation3 + $0x48] sm:$0xff] %vm27_vm7, %v2744_v3 }
  0x95   :  { %v1934_v10 = vpop.permute.xlu1 %447  ;;  %v1936_v11 = vpop.permute.xlu0 %444  ;;  %v611_v42 = vmul.f32 %v1912_v62, %v559_v26  ;;  %54 = vst.msk [vmem:[#allocation3 + $0x50] sm:$0xff] %vm27_vm7, %v2744_v3 }
  0x96   :  { %vm468_vm5 = vcmp.eq.s32.totalorder %v1936_v11, %v1907_v61  ;;  %55 = vst.msk [vmem:[#allocation3 + $0x58] sm:$0xff] %vm27_vm7, %v2744_v3  ;;  %vm469_vm9 = vcmp.eq.s32.totalorder %v1934_v10, %v1907_v61 }
  0x97   :  { %v627_v60 = vmul.f32 %v1579_v47, %v611_v42  ;;  %56 = vst.msk [vmem:[#allocation3 + $0x60] sm:$0xff] %vm27_vm7, %v2744_v3  ;;  %v1585_v10 = vsel %vm469_vm9, 1.0, %v2744_v3 }
  0x98   :  { %57 = vst.msk [vmem:[#allocation3 + $0x68] sm:$0xff] %vm27_vm7, %v2744_v3 }
  0x99   :  { %v2057_v17 = vmul.f32 %v2039_v1, %v627_v60  ;;  %58 = vst.msk [vmem:[#allocation3 + $0x70] sm:$0xff] %vm27_vm7, %v2744_v3 }
  0x9a   :  { %59 = vst.msk [vmem:[#allocation3 + $0x78] sm:$0xff] %vm27_vm7, %v2744_v3 }
  0x9b   :  { %60 = vst.msk [vmem:[#allocation4] sm:$0xff] %vm27_vm7, %v2744_v3 }
  0x9c   :  { %v574_v4 = vpop.permute.xlu2 %573  ;;  %61 = vst.msk [vmem:[#allocation4 + $0x8] sm:$0xff] %vm27_vm7, %v2744_v3 }
  0x9d   :  { %v524_v15 = vpop.permute.xlu1 %523  ;;  %v1945_v16 = vpop.permute.xlu0 %453  ;;  %62 = vst.msk [vmem:[#allocation4 + $0x10] sm:$0xff] %vm27_vm7, %v2744_v3 }
  0x9e   :  { %v604_v18 = vmul.f32 %v1912_v62, %v524_v15  ;;  %v614_v15 = vmul.f32 %v1912_v62, %v574_v4  ;;  %63 = vst.msk [vmem:[#allocation4 + $0x18] sm:$0xff] %vm27_vm7, %v2744_v3 }
  0x9f   :  { %64 = vst.msk [vmem:[#allocation4 + $0x20] sm:$0xff] %vm27_vm7, %v2744_v3 }
  0xa0   :  { %v620_v21 = vmul.f32 %v1572_v19, %v604_v18  ;;  %v630_v25 = vmul.f32 %v1582_v8, %v614_v15  ;;  %65 = vst.msk [vmem:[#allocation4 + $0x28] sm:$0xff] %vm27_vm7, %v2744_v3 }
  0xa1   :  { %66 = vst.msk [vmem:[#allocation4 + $0x30] sm:$0xff] %vm27_vm7, %v2744_v3 }
  0xa2   :  { %v1959_v23 = vmul.f32 %v1951_v20, %v620_v21  ;;  %v2099_v34 = vmul.f32 %v2090_v28, %v630_v25  ;;  %67 = vst.msk [vmem:[#allocation4 + $0x38] sm:$0xff] %vm27_vm7, %v2744_v3 }
  0xa3   :  { %68 = vst.msk [vmem:[#allocation4 + $0x40] sm:$0xff] %vm27_vm7, %v2744_v3 }
  0xa4   :  { %1133 = vadd.xlane.f32.xlu2 %v1959_v23  ;;  %69 = vst.msk [vmem:[#allocation4 + $0x48] sm:$0xff] %vm27_vm7, %v2744_v3 }
  0xa5   :  { %v539_v29 = vpop.permute.xlu1 %538  ;;  %v534_v30 = vpop.permute.xlu0 %533  ;;  %70 = vst.msk [vmem:[#allocation4 + $0x50] sm:$0xff] %vm27_vm7, %v2744_v3 }
  0xa6   :  { %v607_v35 = vmul.f32 %v1912_v62, %v539_v29  ;;  %v606_v36 = vmul.f32 %v1912_v62, %v534_v30  ;;  %v2093_v29 = vsel %vm351_vm1, 1.0, %v2744_v3  ;;  %v2096_v30 = vsel %vm350_vm3, 1.0, %v2744_v3  ;;  %71 = vst.msk [vmem:[#allocation4 + $0x58] sm:$0xff] %vm27_vm7, %v2744_v3 }
  0xa7   :  { %72 = vst.msk [vmem:[#allocation4 + $0x60] sm:$0xff] %vm27_vm7, %v2744_v3 }
  0xa8   :  { %v623_v40 = vmul.f32 %v1575_v37, %v607_v35  ;;  %v622_v41 = vmul.f32 %v1574_v33, %v606_v36  ;;  %73 = vst.msk [vmem:[#allocation4 + $0x68] sm:$0xff] %vm27_vm7, %v2744_v3 }
  0xa9   :  { %74 = vst.msk [vmem:[#allocation4 + $0x70] sm:$0xff] %vm27_vm7, %v2744_v3 }
  0xaa   :  { %v2002_v43 = vmul.f32 %v1988_v38, %v623_v40  ;;  %v2008_v45 = vmul.f32 %v1991_v39, %v622_v41  ;;  %75 = vst.msk [vmem:[#allocation4 + $0x78] sm:$0xff] %vm27_vm7, %v2744_v3 }
  0xab   :  { %76 = vst.msk [vmem:[#allocation5] sm:$0xff] %vm27_vm7, %v2744_v3 }
  0xac   :  { %1139 = vadd.xlane.f32.xlu0 %v2002_v43  ;;  %1141 = vadd.xlane.f32.xlu2 %v2005_v44  ;;  %78 = vst.msk [vmem:[#allocation5 + $0x10] sm:$0xff] %vm27_vm7, %v2744_v3 }
  0xad   :  { %1137 = vadd.xlane.f32.xlu1 %v2008_v45  ;;  %v554_v54 = vpop.permute.xlu1 %553  ;;  %v549_v57 = vpop.permute.xlu0 %548  ;;  %79 = vst.msk [vmem:[#allocation5 + $0x18] sm:$0xff] %vm27_vm7, %v2744_v3 }
  0xae   :  { %v610_v63 = vmul.f32 %v1912_v62, %v554_v54  ;;  %v609_v0 = vmul.f32 %v1912_v62, %v549_v57  ;;  %80 = vst.msk [vmem:[#allocation5 + $0x20] sm:$0xff] %vm27_vm7, %v2744_v3 }
  0xaf   :  { %81 = vst.msk [vmem:[#allocation5 + $0x28] sm:$0xff] %vm27_vm7, %v2744_v3 }
  0xb0   :  { %v626_v13 = vmul.f32 %v1578_v2, %v610_v63  ;;  %v625_v14 = vmul.f32 %v1577_v53, %v609_v0  ;;  %v1584_v63 = vsel %vm468_vm5, 1.0, %v2744_v3  ;;  %82 = vst.msk [vmem:[#allocation5 + $0x30] sm:$0xff] %vm27_vm7, %v2744_v3 }
  0xb1   :  { %83 = vst.msk [vmem:[#allocation5 + $0x38] sm:$0xff] %vm27_vm7, %v2744_v3 }
  0xb2   :  { %v2060_v18 = vmul.f32 %v2045_v6, %v626_v13  ;;  %v2063_v19 = vmul.f32 %v2048_v12, %v625_v14  ;;  %v2137_v13 = vsel %vm354_vm6, 1.0, %v2744_v3  ;;  %84 = vst.msk [vmem:[#allocation5 + $0x40] sm:$0xff] %vm27_vm7, %v2744_v3 }
  0xb3   :  { %85 = vst.msk [vmem:[#allocation5 + $0x48] sm:$0xff] %vm27_vm7, %v2744_v3 }
  0xb4   :  { %1147 = vadd.xlane.f32.xlu2 %v2057_v17  ;;  %1145 = vadd.xlane.f32.xlu0 %v2060_v18  ;;  %86 = vst.msk [vmem:[#allocation5 + $0x50] sm:$0xff] %vm27_vm7, %v2744_v3 }
  0xb5   :  { %1143 = vadd.xlane.f32.xlu1 %v2063_v19  ;;  %v569_v22 = vpop.permute.xlu1 %568  ;;  %v564_v24 = vpop.permute.xlu0 %563  ;;  %87 = vst.msk [vmem:[#allocation5 + $0x58] sm:$0xff] %vm27_vm7, %v2744_v3 }
  0xb6   :  { %v613_v26 = vmul.f32 %v1912_v62, %v569_v22  ;;  %v612_v9 = vmul.f32 %v1912_v62, %v564_v24  ;;  %88 = vst.msk [vmem:[#allocation5 + $0x60] sm:$0xff] %vm27_vm7, %v2744_v3 }
  0xb7   :  { %89 = vst.msk [vmem:[#allocation5 + $0x68] sm:$0xff] %vm27_vm7, %v2744_v3 }
  0xb8   :  { %v629_v32 = vmul.f32 %v1581_v27, %v613_v26  ;;  %v628_v33 = vmul.f32 %v1580_v50, %v612_v9  ;;  %90 = vst.msk [vmem:[#allocation5 + $0x70] sm:$0xff] %vm27_vm7, %v2744_v3 }
  0xb9   :  { %91 = vst.msk [vmem:[#allocation5 + $0x78] sm:$0xff] %vm27_vm7, %v2744_v3 }
  0xba   :  { %v2102_v35 = vmul.f32 %v2093_v29, %v629_v32  ;;  %v644_v36 = vmul.f32 %v2096_v30, %v628_v33  ;;  %v300_v32 = vadd.s32 104, %v1895_v55 }
  0xbc   :  { %1153 = vadd.xlane.f32.xlu2 %v2099_v34  ;;  %1151 = vadd.xlane.f32.xlu0 %v2102_v35  ;;  %vm339_vm8 = vcmp.ne.s32.totalorder %v300_v32, %v1900_v58 }
  0xbd   :  { %1149 = vadd.xlane.f32.xlu1 %v644_v36  ;;  %v584_v57 = vpop.permute.xlu1 %583  ;;  %v2180_v27 = vpop.permute.xlu0 %578  ;;  %vm355_vm10 = vmand %vm325_vm0, %vm339_vm8 }
  0xc1   :  { %v229_v37 = vpop.f32.mrf.mxu0  ;;  %v239_v40 = vpop.f32.mrf.mxu1 }
  0xc2   :  { %v2107_v41 = vmul.f32 14.285714, %v229_v37  ;;  %v2109_v42 = vmul.f32 14.285714, %v239_v40 }
  0xc4   :  { %668 = vmax.xlane.f32.xlu2 %v2107_v41  ;;  %v1041_v46 = vmul.f32 %v2005_v44, %v2109_v42  ;;  %v1037_v47 = vmul.f32 %v1959_v23, %v2107_v41  ;;  %v616_v23 = vmul.f32 %v1912_v62, %v584_v57 }
  0xc6   :  { %1061 = vadd.xlane.f32.xlu0 %v1041_v46  ;;  %1053 = vadd.xlane.f32.xlu1 %v1037_v47  ;;  %v632_v0 = vmul.f32 %v1584_v63, %v616_v23  ;;  %v301_v47 = vadd.s32 112, %v1895_v55 }
  0xc8   :  { %v249_v48 = vpop.f32.mrf.mxu2  ;;  %v259_v49 = vpop.f32.mrf.mxu3  ;;  %v2142_v14 = vmul.f32 %v2137_v13, %v632_v0  ;;  %vm340_vm11 = vcmp.ne.s32.totalorder %v301_v47, %v1900_v58 }
  0xc9   :  { %v2117_v53 = vmul.f32 14.285714, %v249_v48  ;;  %v2119_v54 = vmul.f32 14.285714, %v259_v49  ;;  %v231_v44 = vpop.f32.mrf.mxu0  ;;  %v241_v11 = vpop.f32.mrf.mxu1  ;;  %v2221_v49 = vsel %vm355_vm10, 1.0, %v2744_v3  ;;  %vm356_vm13 = vmand %vm325_vm0, %vm340_vm11 }
  0xca   :  { %v2132_v2 = vmul.f32 14.285714, %v231_v44  ;;  %v2150_v8 = vmul.f32 14.285714, %v241_v11 }
  0xcb   :  { %v1045_v60 = vmul.f32 %v644_v36, %v2117_v53  ;;  %v1049_v21 = vmul.f32 %v2142_v14, %v2119_v54 }
  0xcc   :  { %676 = vmax.xlane.f32.xlu2 %v2109_v42  ;;  %v1042_v25 = vmul.f32 %v2063_v19, %v2150_v8  ;;  %v1038_v9 = vmul.f32 %v1927_v7, %v2132_v2  ;;  %v589_v19 = vpop.permute.xlu2 %588 }
  0xcd   :  { %v617_v33 = vmul.f32 %v1912_v62, %v589_v19 }
  0xce   :  { %684 = vmax.xlane.f32.xlu0 %v2117_v53  ;;  %692 = vmax.xlane.f32.xlu1 %v2119_v54 }
  0xcf   :  { %v633_v48 = vmul.f32 %v1585_v10, %v617_v33  ;;  %v615_v33 = vmul.f32 %v1912_v62, %v2180_v27 }
  0xd0   :  { %v251_v59 = vpop.f32.mrf.mxu2  ;;  %v261_v24 = vpop.f32.mrf.mxu3 }
  0xd1   :  { %v2134_v4 = vmul.f32 14.285714, %v251_v59  ;;  %v234_v15 = vpop.f32.mrf.mxu0  ;;  %v244_v50 = vpop.f32.mrf.mxu1  ;;  %v2198_v36 = vmul.f32 14.285714, %v261_v24  ;;  %v2238_v23 = vmul.f32 %v2221_v49, %v633_v48  ;;  %v1117_v48 = vld [vmem:[#allocation5] sm:$0xff] }
  0xd2   :  { %v2152_v22 = vmul.f32 14.285714, %v234_v15  ;;  %v2174_v26 = vmul.f32 14.285714, %v244_v50  ;;  %v1118_v15 = vld [vmem:[#allocation5 + $0x8] sm:$0xff] }
  0xd3   :  { %v1046_v40 = vmul.f32 %v2102_v35, %v2134_v4  ;;  %v594_v35 = vpop.permute.xlu0 %593  ;;  %v1050_v56 = vmul.f32 %v2238_v23, %v2198_v36 }
  0xd4   :  { %1069 = vadd.xlane.f32.xlu2 %v1045_v60  ;;  %v618_v57 = vmul.f32 %v1912_v62, %v594_v35  ;;  %v1039_v44 = vmul.f32 %v2008_v45, %v2152_v22  ;;  %v1586_v45 = vsel %vm470_vm12, 1.0, %v2744_v3  ;;  %v1043_v11 = vmul.f32 %v2060_v18, %v2174_v26 }
  0xd5   :  { %v1712_v62 = vmov -inf  }
  0xd6   :  { %686 = vmax.xlane.f32.xlu1 %v2134_v4  ;;  %670 = vmax.xlane.f32.xlu0 %v2132_v2  ;;  %v634_v60 = vmul.f32 %v1586_v45, %v618_v57  ;;  %28 = vst.msk [vmem:[#allocation2] sm:$0xff] %vm27_vm7, %v1712_v62 }
  0xd7   :  { %29 = vst.msk [vmem:[#allocation2 + $0x8] sm:$0xff] %vm27_vm7, %v1712_v62 }
  0xd8   :  { %v264_v7 = vpop.f32.mrf.mxu3  ;;  %v254_v46 = vpop.f32.mrf.mxu2  ;;  %30 = vst.msk [vmem:[#allocation2 + $0x10] sm:$0xff] %vm27_vm7, %v1712_v62 }
  0xd9   :  { %v2204_v37 = vmul.f32 14.285714, %v264_v7  ;;  %v2225_v52 = vmul.f32 14.285714, %v254_v46  ;;  %v246_v24 = vpop.f32.mrf.mxu1  ;;  %v298_v7 = vadd.s32 88, %v1895_v55  ;;  %v1583_v46 = vsel %vm467_vm15, 1.0, %v2744_v3 }
  0xda   :  { %v631_v47 = vmul.f32 %v1583_v46, %v615_v33  ;;  %31 = vst.msk [vmem:[#allocation2 + $0x18] sm:$0xff] %vm27_vm7, %v1712_v62  ;;  %v519_v33 = vld [vmem:[%s2741_s4 + $0x78] sm:$0xff]  ;;  %v1127_v46 = vld [vmem:[#allocation5 + $0x50] sm:$0xff] }
  0xdb   :  { %v1047_v59 = vmul.f32 %v2099_v34, %v2225_v52  ;;  %v2258_v34 = vsel %vm356_vm13, 1.0, %v2744_v3  ;;  %vm337_vm14 = vcmp.ne.s32.totalorder %v298_v7, %v1900_v58  ;;  %32 = vst.msk [vmem:[#allocation2 + $0x20] sm:$0xff] %vm27_vm7, %v1712_v62 }
  0xdc   :  { %1077 = vadd.xlane.f32.xlu2 %v1049_v21  ;;  %v2267_v63 = vmul.f32 %v2258_v34, %v634_v60  ;;  %v236_v21 = vpop.f32.mrf.mxu0  ;;  %vm353_vm1 = vmand %vm325_vm0, %vm337_vm14  ;;  %33 = vst.msk [vmem:[#allocation2 + $0x28] sm:$0xff] %vm27_vm7, %v1712_v62 }
  0xdd   :  { %v2286_v18 = vmul.f32 14.285714, %v236_v21  ;;  %v2333_v51 = vsel %vm353_vm1, 1.0, %v2744_v3  ;;  %34 = vst.msk [vmem:[#allocation2 + $0x30] sm:$0xff] %vm27_vm7, %v1712_v62 }
  0xde   :  { %678 = vmax.xlane.f32.xlu0 %v2150_v8  ;;  %672 = vmax.xlane.f32.xlu1 %v2152_v22  ;;  %v1051_v0 = vmul.f32 %v2267_v63, %v2204_v37  ;;  %v647_v61 = vmul.f32 %v2333_v51, %v631_v47  ;;  %35 = vst.msk [vmem:[#allocation2 + $0x38] sm:$0xff] %vm27_vm7, %v1712_v62  ;;  %v1126_v47 = vld [vmem:[#allocation5 + $0x48] sm:$0xff] }
  0xdf   :  { %v1040_v19 = vmul.f32 %v2002_v43, %v2286_v18  ;;  %36 = vst.msk [vmem:[#allocation2 + $0x40] sm:$0xff] %vm27_vm7, %v1712_v62 }
  0xe0   :  { %v266_v43 = vpop.f32.mrf.mxu3  ;;  %37 = vst.msk [vmem:[#allocation2 + $0x48] sm:$0xff] %vm27_vm7, %v1712_v62 }
  0xe1   :  { %v2324_v10 = vmul.f32 14.285714, %v266_v43  ;;  %38 = vst.msk [vmem:[#allocation2 + $0x50] sm:$0xff] %vm27_vm7, %v1712_v62 }
  0xe2   :  { %39 = vst.msk [vmem:[#allocation2 + $0x58] sm:$0xff] %vm27_vm7, %v1712_v62 }
  0xe3   :  { %40 = vst.msk [vmem:[#allocation2 + $0x60] sm:$0xff] %vm27_vm7, %v1712_v62 }
  0xe4   :  { %1063 = vadd.xlane.f32.xlu2 %v1042_v25  ;;  %41 = vst.msk [vmem:[#allocation2 + $0x68] sm:$0xff] %vm27_vm7, %v1712_v62 }
  0xe5   :  { %42 = vst.msk [vmem:[#allocation2 + $0x70] sm:$0xff] %vm27_vm7, %v1712_v62 }
  0xe6   :  { %1055 = vadd.xlane.f32.xlu0 %v1038_v9  ;;  %680 = vmax.xlane.f32.xlu1 %v2174_v26  ;;  %v2288_v9 = vmul.f32 14.285714, %v246_v24  ;;  %v1123_v24 = vld [vmem:[#allocation5 + $0x30] sm:$0xff]  ;;  %43 = vst.msk [vmem:[#allocation2 + $0x78] sm:$0xff] %vm27_vm7, %v1712_v62 }
  0xe8   :  { %v1044_v32 = vmul.f32 %v2057_v17, %v2288_v9  ;;  %v256_v17 = vpop.f32.mrf.mxu2 }
  0xec   :  { %694 = vmax.xlane.f32.xlu2 %v2198_v36 }
  0xee   :  { %696 = vmax.xlane.f32.xlu0 %v2204_v37  ;;  %1071 = vadd.xlane.f32.xlu1 %v1046_v40  ;;  %v2322_v40 = vmul.f32 14.285714, %v256_v17 }
  0xf0   :  { %v1048_v27 = vmul.f32 %v647_v61, %v2322_v40 }
  0xf4   :  { %1057 = vadd.xlane.f32.xlu2 %v1039_v44  ;;  %v1121_v44 = vld [vmem:[#allocation5 + $0x20] sm:$0xff] }
  0xf6   :  { %1073 = vadd.xlane.f32.xlu0 %v1047_v59  ;;  %1079 = vadd.xlane.f32.xlu1 %v1050_v56  ;;  %v1120_v59 = vld [vmem:[#allocation5 + $0x18] sm:$0xff]  ;;  %v1119_v56 = vld [vmem:[#allocation5 + $0x10] sm:$0xff] }
  0xfc   :  { %688 = vmax.xlane.f32.xlu2 %v2225_v52 }
  0xfe   :  { %1081 = vadd.xlane.f32.xlu0 %v1051_v0  ;;  %1065 = vadd.xlane.f32.xlu1 %v1043_v11  ;;  %v1136_v50 = vpop.xlane.xlu1 %1135 }
  0xff   :  { %v1166_v25 = vadd.f32 %v1136_v50, %v1118_v15  ;;  %v1122_v50 = vld [vmem:[#allocation5 + $0x28] sm:$0xff] }
 0x101   :  { %1182 = vst.msk [vmem:[#allocation5 + $0x8] sm:$0xff] %vm27_vm7, %v1166_v25 }
 0x104   :  { %674 = vmax.xlane.f32.xlu2 %v2286_v18 }
 0x106   :  { %1067 = vadd.xlane.f32.xlu0 %v1044_v32  ;;  %1059 = vadd.xlane.f32.xlu1 %v1040_v19 }
 0x10c   :  { %682 = vmax.xlane.f32.xlu2 %v2288_v9 }
 0x10e   :  { %690 = vmax.xlane.f32.xlu0 %v2322_v40  ;;  %698 = vmax.xlane.f32.xlu1 %v2324_v10 }
 0x116   :  { %1075 = vadd.xlane.f32.xlu0 %v1048_v27  ;;  %1155 = vadd.xlane.f32.xlu1 %v647_v61  ;;  %v1125_v61 = vld [vmem:[#allocation5 + $0x40] sm:$0xff] }
 0x117   :  { %v1134_v35 = vpop.xlane.xlu2 %1133 }
 0x118   :  { %v1165_v57 = vadd.f32 %v1134_v35, %v1117_v48 }
 0x11a   :  { %1181 = vst.msk [vmem:[#allocation5] sm:$0xff] %vm27_vm7, %v1165_v57 }
 0x11e   :  { %1157 = vadd.xlane.f32.xlu0 %v2142_v14  ;;  %v1124_v14 = vld [vmem:[#allocation5 + $0x38] sm:$0xff] }
 0x11f   :  { %v1142_v45 = vpop.xlane.xlu2 %1141  ;;  %v1140_v60 = vpop.xlane.xlu0 %1139 }
 0x120   :  { %v1169_v0 = vadd.f32 %v1142_v45, %v1121_v44  ;;  %v1138_v11 = vpop.xlane.xlu1 %1137  ;;  %v1168_v15 = vadd.f32 %v1140_v60, %v1120_v59  ;;  %v2367_v59 = vld [vmem:[#allocation2] sm:$0xff] }
 0x121   :  { %v1167_v21 = vadd.f32 %v1138_v11, %v1119_v56  ;;  %v1025_v45 = vld [vmem:[#allocation4 + $0x20] sm:$0xff] }
 0x122   :  { %1185 = vst.msk [vmem:[#allocation5 + $0x20] sm:$0xff] %vm27_vm7, %v1169_v0  ;;  %v1021_v60 = vld [vmem:[#allocation4] sm:$0xff] }
 0x123   :  { %1183 = vst.msk [vmem:[#allocation5 + $0x10] sm:$0xff] %vm27_vm7, %v1167_v21 }
 0x124   :  { %1184 = vst.msk [vmem:[#allocation5 + $0x18] sm:$0xff] %vm27_vm7, %v1168_v15 }
 0x127   :  { %v1148_v25 = vpop.xlane.xlu2 %1147  ;;  %v1146_v32 = vpop.xlane.xlu0 %1145 }
 0x128   :  { %v1172_v19 = vadd.f32 %v1148_v25, %v1124_v14  ;;  %v1144_v7 = vpop.xlane.xlu1 %1143  ;;  %v1171_v17 = vadd.f32 %v1146_v32, %v1123_v24  ;;  %v2376_v24 = vld [vmem:[#allocation2 + $0x20] sm:$0xff] }
 0x129   :  { %v1170_v43 = vadd.f32 %v1144_v7, %v1122_v50  ;;  %v2378_v25 = vld [vmem:[#allocation2 + $0x40] sm:$0xff] }
 0x12a   :  { %1188 = vst.msk [vmem:[#allocation5 + $0x38] sm:$0xff] %vm27_vm7, %v1172_v19  ;;  %v2380_v32 = vld [vmem:[#allocation2 + $0x60] sm:$0xff] }
 0x12b   :  { %1186 = vst.msk [vmem:[#allocation5 + $0x28] sm:$0xff] %vm27_vm7, %v1170_v43 }
 0x12c   :  { %1187 = vst.msk [vmem:[#allocation5 + $0x30] sm:$0xff] %vm27_vm7, %v1171_v17 }
 0x12d   :  { %2769 = vst [vmem:[#allocation6_spill] sm:$0xff] %v2380_v32 }
 0x12f   :  { %v1154_v62 = vpop.xlane.xlu2 %1153  ;;  %v1152_v27 = vpop.xlane.xlu0 %1151  ;;  %598 = vperm.xlu1 %1632, %v519_v33  }
 0x130   :  { %v1175_v48 = vadd.f32 %v1154_v62, %v1127_v46  ;;  %v1150_v35 = vpop.xlane.xlu1 %1149  ;;  %v1174_v57 = vadd.f32 %v1152_v27, %v1126_v47  ;;  %v2403_v27 = vld [vmem:[#allocation2 + $0x48] sm:$0xff] }
 0x131   :  { %v1173_v44 = vadd.f32 %v1150_v35, %v1125_v61  ;;  %v1029_v61 = vld [vmem:[#allocation4 + $0x40] sm:$0xff]  ;;  %2771 = vst [vmem:[#allocation8_spill] sm:$0xff] %v2403_v27 }
 0x132   :  { %1191 = vst.msk [vmem:[#allocation5 + $0x50] sm:$0xff] %vm27_vm7, %v1175_v48  ;;  %v2405_v48 = vld [vmem:[#allocation2 + $0x8] sm:$0xff] }
 0x133   :  { %1189 = vst.msk [vmem:[#allocation5 + $0x40] sm:$0xff] %vm27_vm7, %v1173_v44 }
 0x134   :  { %1190 = vst.msk [vmem:[#allocation5 + $0x48] sm:$0xff] %vm27_vm7, %v1174_v57 }
 0x135   :  { %2772 = vst [vmem:[#allocation9_spill] sm:$0xff] %v2405_v48 }
 0x137   :  { %v669_v56 = vpop.xlane.xlu2 %668 }
 0x138   :  { %v2370_v0 = vmax.f32 %v2367_v59, %v669_v56 }
 0x139   :  { %v1062_v11 = vpop.xlane.xlu0 %1061  ;;  %v1054_v15 = vpop.xlane.xlu1 %1053 }
 0x13a   :  { %1005 = vst.msk [vmem:[#allocation2] sm:$0xff] %vm27_vm7, %v2370_v0  ;;  %v1089_v21 = vadd.f32 %v1062_v11, %v1025_v45  ;;  %v1085_v14 = vadd.f32 %v1054_v15, %v1021_v60  ;;  %v1033_v15 = vld [vmem:[#allocation4 + $0x60] sm:$0xff] }
 0x13c   :  { %1105 = vst.msk [vmem:[#allocation4 + $0x20] sm:$0xff] %vm27_vm7, %v1089_v21 }
 0x13d   :  { %1101 = vst.msk [vmem:[#allocation4] sm:$0xff] %vm27_vm7, %v1085_v14  ;;  %v2423_v14 = vld [vmem:[#allocation2 + $0x28] sm:$0xff] }
 0x13f   :  { %v677_v50 = vpop.xlane.xlu2 %676 }
 0x140   :  { %v2383_v19 = vmax.f32 %v2376_v24, %v677_v50  ;;  %v2425_v50 = vld [vmem:[#allocation2 + $0x10] sm:$0xff] }
 0x141   :  { %v685_v7 = vpop.xlane.xlu0 %684  ;;  %v693_v17 = vpop.xlane.xlu1 %692 }
 0x142   :  { %1009 = vst.msk [vmem:[#allocation2 + $0x20] sm:$0xff] %vm27_vm7, %v2383_v19  ;;  %v2388_v43 = vmax.f32 %v2378_v25, %v685_v7  ;;  %v2391_v33 = vmax.f32 %v2380_v32, %v693_v17 }
 0x144   :  { %2770 = vst [vmem:[#allocation7_spill] sm:$0xff] %v2391_v33  ;;  %858 = vperm.xlu0 %1631, %v2391_v33   ;;  %838 = vperm.xlu1 %1632, %v2388_v43  }
 0x145   :  { %1013 = vst.msk [vmem:[#allocation2 + $0x40] sm:$0xff] %vm27_vm7, %v2388_v43 }
 0x146   :  { %1017 = vst.msk [vmem:[#allocation2 + $0x60] sm:$0xff] %vm27_vm7, %v2391_v33 }
 0x147   :  { %v1070_v62 = vpop.xlane.xlu2 %1069 }
 0x148   :  { %v1093_v35 = vadd.f32 %v1070_v62, %v1029_v61 }
 0x149   :  { %v687_v57 = vpop.xlane.xlu1 %686  ;;  %v671_v44 = vpop.xlane.xlu0 %670 }
 0x14a   :  { %1109 = vst.msk [vmem:[#allocation4 + $0x40] sm:$0xff] %vm27_vm7, %v1093_v35  ;;  %v2409_v56 = vmax.f32 %v2403_v27, %v687_v57  ;;  %v2412_v45 = vmax.f32 %v2405_v48, %v671_v44  ;;  %v1035_v27 = vld [vmem:[#allocation4 + $0x70] sm:$0xff] }
 0x14c   :  { %2773 = vst [vmem:[#allocation10_spill] sm:$0xff] %v2409_v56  ;;  %803 = vperm.xlu0 %1631, %v2412_v45  }
 0x14d   :  { %2774 = vst [vmem:[#allocation11_spill] sm:$0xff] %v2412_v45 }
 0x14e   :  { %1014 = vst.msk [vmem:[#allocation2 + $0x48] sm:$0xff] %vm27_vm7, %v2409_v56 }
 0x14f   :  { %1006 = vst.msk [vmem:[#allocation2 + $0x8] sm:$0xff] %vm27_vm7, %v2412_v45  ;;  %v1078_v21 = vpop.xlane.xlu2 %1077 }
 0x150   :  { %v1097_v7 = vadd.f32 %v1078_v21, %v1033_v15  ;;  %v1026_v15 = vld [vmem:[#allocation4 + $0x28] sm:$0xff] }
 0x151   :  { %v679_v17 = vpop.xlane.xlu0 %678  ;;  %v673_v61 = vpop.xlane.xlu1 %672 }
 0x152   :  { %1113 = vst.msk [vmem:[#allocation4 + $0x60] sm:$0xff] %vm27_vm7, %v1097_v7  ;;  %v2429_v62 = vmax.f32 %v2423_v14, %v679_v17  ;;  %v2432_v35 = vmax.f32 %v2425_v50, %v673_v61  ;;  %v1022_v7 = vld [vmem:[#allocation4 + $0x8] sm:$0xff]  ;;  %v2444_v17 = vld [vmem:[#allocation2 + $0x30] sm:$0xff] }
 0x153   :  { %2775 = vst [vmem:[#allocation12_spill] sm:$0xff] %v2444_v17 }
 0x154   :  { %1010 = vst.msk [vmem:[#allocation2 + $0x28] sm:$0xff] %vm27_vm7, %v2429_v62  ;;  %843 = vperm.xlu0 %1631, %v2409_v56   ;;  %823 = vperm.xlu1 %1632, %v2429_v62  }
 0x155   :  { %1007 = vst.msk [vmem:[#allocation2 + $0x10] sm:$0xff] %vm27_vm7, %v2432_v35 }
 0x157   :  { %v1064_v21 = vpop.xlane.xlu2 %1063 }
 0x158   :  { %v1090_v61 = vadd.f32 %v1064_v21, %v1026_v15  ;;  %v2457_v15 = vld [vmem:[#allocation2 + $0x68] sm:$0xff] }
 0x159   :  { %v1056_v11 = vpop.xlane.xlu0 %1055  ;;  %v681_v60 = vpop.xlane.xlu1 %680  ;;  %2777 = vst [vmem:[#allocation14_spill] sm:$0xff] %v2457_v15 }
 0x15a   :  { %1106 = vst.msk [vmem:[#allocation4 + $0x28] sm:$0xff] %vm27_vm7, %v1090_v61  ;;  %v1086_v47 = vadd.f32 %v1056_v11, %v1022_v7  ;;  %v2448_v44 = vmax.f32 %v2444_v17, %v681_v60  ;;  %v2459_v61 = vld [vmem:[#allocation2 + $0x70] sm:$0xff]  ;;  %v1030_v11 = vld [vmem:[#allocation4 + $0x48] sm:$0xff] }
 0x15b   :  { %v1031_v17 = vld [vmem:[#allocation4 + $0x50] sm:$0xff] }
 0x15c   :  { %2776 = vst [vmem:[#allocation13_spill] sm:$0xff] %v2448_v44  ;;  %828 = vperm.xlu0 %1631, %v2448_v44   ;;  %808 = vperm.xlu1 %1632, %v2432_v35  }
 0x15d   :  { %1102 = vst.msk [vmem:[#allocation4 + $0x8] sm:$0xff] %vm27_vm7, %v1086_v47 }
 0x15e   :  { %1011 = vst.msk [vmem:[#allocation2 + $0x30] sm:$0xff] %vm27_vm7, %v2448_v44 }
 0x15f   :  { %v695_v21 = vpop.xlane.xlu2 %694 }
 0x160   :  { %v2462_v60 = vmax.f32 %v2457_v15, %v695_v21  ;;  %v1023_v21 = vld [vmem:[#allocation4 + $0x10] sm:$0xff]  ;;  %v1034_v15 = vld [vmem:[#allocation4 + $0x68] sm:$0xff] }
 0x161   :  { %v697_v47 = vpop.xlane.xlu0 %696  ;;  %v1072_v7 = vpop.xlane.xlu1 %1071 }
 0x162   :  { %1018 = vst.msk [vmem:[#allocation2 + $0x68] sm:$0xff] %vm27_vm7, %v2462_v60  ;;  %v2467_v57 = vmax.f32 %v2459_v61, %v697_v47  ;;  %v1094_v46 = vadd.f32 %v1072_v7, %v1030_v11  ;;  %v2478_v7 = vld [vmem:[#allocation2 + $0x50] sm:$0xff] }
 0x163   :  { %2778 = vst [vmem:[#allocation15_spill] sm:$0xff] %v2478_v7 }
 0x164   :  { %1019 = vst.msk [vmem:[#allocation2 + $0x70] sm:$0xff] %vm27_vm7, %v2467_v57  ;;  %868 = vperm.xlu1 %1632, %v2467_v57  }
 0x165   :  { %1110 = vst.msk [vmem:[#allocation4 + $0x48] sm:$0xff] %vm27_vm7, %v1094_v46  ;;  %v1027_v46 = vld [vmem:[#allocation4 + $0x30] sm:$0xff] }
 0x167   :  { %v1058_v44 = vpop.xlane.xlu2 %1057 }
 0x168   :  { %v1087_v45 = vadd.f32 %v1058_v44, %v1023_v21  ;;  %v1024_v21 = vld [vmem:[#allocation4 + $0x18] sm:$0xff] }
 0x169   :  { %v1074_v48 = vpop.xlane.xlu0 %1073  ;;  %v1080_v56 = vpop.xlane.xlu1 %1079 }
 0x16a   :  { %1103 = vst.msk [vmem:[#allocation4 + $0x10] sm:$0xff] %vm27_vm7, %v1087_v45  ;;  %v1095_v11 = vadd.f32 %v1074_v48, %v1031_v17  ;;  %v1098_v47 = vadd.f32 %v1080_v56, %v1034_v15  ;;  %v2487_v56 = vld [vmem:[#allocation2 + $0x18] sm:$0xff] }
 0x16b   :  { %2779 = vst [vmem:[#allocation16_spill] sm:$0xff] %v2487_v56  ;;  %v1028_v15 = vld [vmem:[#allocation4 + $0x38] sm:$0xff] }
 0x16c   :  { %1111 = vst.msk [vmem:[#allocation4 + $0x50] sm:$0xff] %vm27_vm7, %v1095_v11 }
 0x16d   :  { %1114 = vst.msk [vmem:[#allocation4 + $0x68] sm:$0xff] %vm27_vm7, %v1098_v47 }
 0x16f   :  { %v689_v3 = vpop.xlane.xlu2 %688 }
 0x170   :  { %v2481_v33 = vmax.f32 %v2478_v7, %v689_v3 }
 0x171   :  { %v1082_v32 = vpop.xlane.xlu0 %1081  ;;  %v1066_v44 = vpop.xlane.xlu1 %1065 }
 0x172   :  { %1015 = vst.msk [vmem:[#allocation2 + $0x50] sm:$0xff] %vm27_vm7, %v2481_v33  ;;  %v1099_v45 = vadd.f32 %v1082_v32, %v1035_v27  ;;  %v1091_v48 = vadd.f32 %v1066_v44, %v1027_v46  ;;  %v2499_v46 = vld [vmem:[#allocation2 + $0x38] sm:$0xff] }
 0x173   :  { %2781 = vst [vmem:[#allocation18_spill] sm:$0xff] %v2499_v46 }
 0x174   :  { %1115 = vst.msk [vmem:[#allocation4 + $0x70] sm:$0xff] %vm27_vm7, %v1099_v45  ;;  %v2501_v45 = vld [vmem:[#allocation2 + $0x58] sm:$0xff] }
 0x175   :  { %1107 = vst.msk [vmem:[#allocation4 + $0x30] sm:$0xff] %vm27_vm7, %v1091_v48  ;;  %v2503_v48 = vld [vmem:[#allocation2 + $0x78] sm:$0xff] }
 0x176   :  { %2782 = vst [vmem:[#allocation19_spill] sm:$0xff] %v2503_v48 }
 0x177   :  { %v675_v17 = vpop.xlane.xlu2 %674 }
 0x178   :  { %v2490_v11 = vmax.f32 %v2487_v56, %v675_v17 }
 0x179   :  { %v1068_v3 = vpop.xlane.xlu0 %1067  ;;  %v1060_v47 = vpop.xlane.xlu1 %1059 }
 0x17a   :  { %2780 = vst [vmem:[#allocation17_spill] sm:$0xff] %v2490_v11  ;;  %v1092_v32 = vadd.f32 %v1068_v3, %v1028_v15  ;;  %v1088_v27 = vadd.f32 %v1060_v47, %v1024_v21  ;;  %813 = vperm.xlu0 %1631, %v2490_v11   ;;  %v1129_v3 = vld [vmem:[#allocation5 + $0x60] sm:$0xff] }
 0x17b   :  { %1008 = vst.msk [vmem:[#allocation2 + $0x18] sm:$0xff] %vm27_vm7, %v2490_v11 }
 0x17c   :  { %1108 = vst.msk [vmem:[#allocation4 + $0x38] sm:$0xff] %vm27_vm7, %v1092_v32  ;;  %v1128_v32 = vld [vmem:[#allocation5 + $0x58] sm:$0xff] }
 0x17d   :  { %1104 = vst.msk [vmem:[#allocation4 + $0x18] sm:$0xff] %vm27_vm7, %v1088_v27 }
 0x17f   :  { %v683_v44 = vpop.xlane.xlu2 %682 }
 0x180   :  { %v2506_v17 = vmax.f32 %v2499_v46, %v683_v44 }
 0x181   :  { %v691_v7 = vpop.xlane.xlu0 %690  ;;  %v699_v56 = vpop.xlane.xlu1 %698 }
 0x182   :  { %1012 = vst.msk [vmem:[#allocation2 + $0x38] sm:$0xff] %vm27_vm7, %v2506_v17  ;;  %v2511_v15 = vmax.f32 %v2501_v45, %v691_v7  ;;  %v2514_v21 = vmax.f32 %v2503_v48, %v699_v56  ;;  %v1032_v7 = vld [vmem:[#allocation4 + $0x58] sm:$0xff]  ;;  %v302_v48 = vadd.s32 120, %v1895_v55 }
 0x184   :  { %2783 = vst [vmem:[#allocation20_spill] sm:$0xff] %v2514_v21  ;;  %853 = vperm.xlu1 %1632, %v2511_v15   ;;  %873 = vperm.xlu0 %1631, %v2514_v21   ;;  %vm341_vm2 = vcmp.ne.s32.totalorder %v302_v48, %v1900_v58 }
 0x185   :  { %1016 = vst.msk [vmem:[#allocation2 + $0x58] sm:$0xff] %vm27_vm7, %v2511_v15  ;;  %vm357_vm4 = vmand %vm325_vm0, %vm341_vm2 }
 0x186   :  { %1020 = vst.msk [vmem:[#allocation2 + $0x78] sm:$0xff] %vm27_vm7, %v2514_v21  ;;  %v1708_v21 = vld [vmem:[%s2739_s3] ss:$0 sm:$0xff] }
 0x187   :  { %vm471_vm3 = vcmp.eq.s32.totalorder %v1945_v16, %v1708_v21 }
 0x189   :  { %v1076_v56 = vpop.xlane.xlu0 %1075  ;;  %v1156_v27 = vpop.xlane.xlu1 %1155 }
 0x18a   :  { %v1096_v44 = vadd.f32 %v1076_v56, %v1032_v7  ;;  %v1176_v46 = vadd.f32 %v1156_v27, %v1128_v32 }
 0x18c   :  { %1112 = vst.msk [vmem:[#allocation4 + $0x58] sm:$0xff] %vm27_vm7, %v1096_v44 }
 0x18d   :  { %1192 = vst.msk [vmem:[#allocation5 + $0x58] sm:$0xff] %vm27_vm7, %v1176_v46 }
 0x191   :  { %v1158_v11 = vpop.xlane.xlu0 %1157 }
 0x192   :  { %v1177_v47 = vadd.f32 %v1158_v11, %v1129_v3  ;;  %v1709_v11 = vld [vmem:[%s2740_s5] ss:$0 sm:$0xff]  ;;  %v2784_v3 = vmov 0.0  }
 0x193   :  { %v2542_v55 = vsel %vm357_vm4, 1.0, %v2784_v3  ;;  %1474 = vst.msk [vmem:[%s2743_s6 + $0x10] sm:$0xff] %vm27_vm7, %v2784_v3 }
 0x194   :  { %1193 = vst.msk [vmem:[#allocation5 + $0x60] sm:$0xff] %vm27_vm7, %v1177_v47  ;;  %v1587_v47 = vsel %vm471_vm3, 1.0, %v2784_v3 }
 0x195   :  { %1475 = vst.msk [vmem:[%s2743_s6 + $0x18] sm:$0xff] %vm27_vm7, %v2784_v3 }
 0x196   :  { %1476 = vst.msk [vmem:[%s2743_s6 + $0x20] sm:$0xff] %vm27_vm7, %v2784_v3 }
 0x197   :  { %1477 = vst.msk [vmem:[%s2743_s6 + $0x28] sm:$0xff] %vm27_vm7, %v2784_v3 }
 0x198   :  { %1478 = vst.msk [vmem:[%s2743_s6 + $0x30] sm:$0xff] %vm27_vm7, %v2784_v3 }
 0x199   :  { %1479 = vst.msk [vmem:[%s2743_s6 + $0x38] sm:$0xff] %vm27_vm7, %v2784_v3 }
 0x19a   :  { %1480 = vst.msk [vmem:[%s2743_s6 + $0x40] sm:$0xff] %vm27_vm7, %v2784_v3 }
 0x19b   :  { %1481 = vst.msk [vmem:[%s2743_s6 + $0x48] sm:$0xff] %vm27_vm7, %v2784_v3 }
 0x19c   :  { %1482 = vst.msk [vmem:[%s2743_s6 + $0x50] sm:$0xff] %vm27_vm7, %v2784_v3 }
 0x19d   :  { %1483 = vst.msk [vmem:[%s2743_s6 + $0x58] sm:$0xff] %vm27_vm7, %v2784_v3 }
 0x19e   :  { %1484 = vst.msk [vmem:[%s2743_s6 + $0x60] sm:$0xff] %vm27_vm7, %v2784_v3 }
 0x19f   :  { %1485 = vst.msk [vmem:[%s2743_s6 + $0x68] sm:$0xff] %vm27_vm7, %v2784_v3 }
 0x1a0   :  { %1486 = vst.msk [vmem:[%s2743_s6 + $0x70] sm:$0xff] %vm27_vm7, %v2784_v3 }
 0x1a1   :  { %v599_v7 = vpop.permute.xlu1 %598  ;;  %1487 = vst.msk [vmem:[%s2743_s6 + $0x78] sm:$0xff] %vm27_vm7, %v2784_v3 }
 0x1a2   :  { %v619_v46 = vmul.f32 %v1709_v11, %v599_v7 }
 0x1a4   :  { %v635_v48 = vmul.f32 %v1587_v47, %v619_v46 }
 0x1a6   :  { %v651_v32 = vmul.f32 %v2542_v55, %v635_v48 }
 0x1a8   :  { %v1052_v56 = vmul.f32 %v651_v32, %v2324_v10 }
 0x1aa   :  { %1083 = vadd.xlane.f32.xlu2 %v1052_v56 }
 0x1b6   :  { %v839_v16 = vpop.permute.xlu1 %838 }
 0x1b7   :  { %v884_v58 = vsub.f32 %v2117_v53, %v839_v16 }
 0x1b9   :  { %v908_v21 = vmul.f32 1.442695, %v884_v58 }
 0x1bb   :  { %1636 = vpow2.f32 %v908_v21 }
 0x1c1   :  { %v1637_v27 = vpop.eup %1636 }
 0x1c2   :  { %798 = vperm.xlu2 %1633, %v2370_v0   ;;  %v932_v44 = vmul.f32 %v1637_v27, %v2096_v30 }
 0x1c4   :  { %956 = vadd.xlane.f32.xlu0 %v932_v44 }
 0x1c6   :  { %v824_v7 = vpop.permute.xlu1 %823 }
 0x1c7   :  { %v881_v11 = vsub.f32 %v2150_v8, %v824_v7 }
 0x1c9   :  { %v902_v46 = vmul.f32 1.442695, %v881_v11 }
 0x1ca   :  { %818 = vperm.xlu2 %1633, %v2383_v19  }
 0x1cb   :  { %1638 = vpow2.f32 %v902_v46 }
 0x1ce   :  { %v809_v47 = vpop.permute.xlu1 %808 }
 0x1cf   :  { %v878_v48 = vsub.f32 %v2152_v22, %v809_v47 }
 0x1d1   :  { %v896_v56 = vmul.f32 1.442695, %v878_v48  ;;  %v1639_v53 = vpop.eup %1638 }
 0x1d2   :  { %863 = vperm.xlu2 %1633, %v2462_v60   ;;  %v929_v16 = vmul.f32 %v1639_v53, %v2048_v12 }
 0x1d3   :  { %1640 = vpow2.f32 %v896_v56 }
 0x1d4   :  { %950 = vadd.xlane.f32.xlu0 %v929_v16 }
 0x1d6   :  { %v869_v30 = vpop.permute.xlu1 %868 }
 0x1d7   :  { %v890_v58 = vsub.f32 %v2204_v37, %v869_v30  ;;  %v859_v37 = vpop.permute.xlu0 %858 }
 0x1d8   :  { %v888_v30 = vsub.f32 %v2119_v54, %v859_v37 }
 0x1d9   :  { %v920_v21 = vmul.f32 1.442695, %v890_v58  ;;  %v1641_v8 = vpop.eup %1640 }
 0x1da   :  { %848 = vperm.xlu2 %1633, %v2481_v33   ;;  %v926_v27 = vmul.f32 %v1641_v8, %v1991_v39  ;;  %v916_v3 = vmul.f32 1.442695, %v888_v30 }
 0x1db   :  { %1642 = vpow2.f32 %v920_v21  ;;  %v2785_v21 = vsub.f32 %v2378_v25, %v2388_v43 }
 0x1dc   :  { %944 = vadd.xlane.f32.xlu0 %v926_v27 }
 0x1dd   :  { %v748_v8 = vmul.f32 1.442695, %v2785_v21 }
 0x1df   :  { %v804_v39 = vpop.permute.xlu0 %803 }
 0x1e1   :  { %v1643_v22 = vpop.eup %1642 }
 0x1e2   :  { %833 = vperm.xlu2 %1633, %v2506_v17   ;;  %v938_v44 = vmul.f32 %v1643_v22, %v2258_v34 }
 0x1e4   :  { %968 = vadd.xlane.f32.xlu0 %v938_v44  ;;  %v877_v44 = vsub.f32 %v2132_v2, %v804_v39 }
 0x1e6   :  { %v894_v37 = vmul.f32 1.442695, %v877_v44  ;;  %v769_v44 = vld [vmem:[#allocation3 + $0x28] sm:$0xff] }
 0x1e7   :  { %v844_v34 = vpop.permute.xlu0 %843 }
 0x1f6   :  { %v854_v12 = vpop.permute.xlu1 %853 }
 0x1f7   :  { %v887_v7 = vsub.f32 %v2322_v40, %v854_v12  ;;  %v1036_v40 = vld [vmem:[#allocation4 + $0x78] sm:$0xff] }
 0x1f9   :  { %v914_v11 = vmul.f32 1.442695, %v887_v7  ;;  %v885_v7 = vsub.f32 %v2134_v4, %v844_v34 }
 0x1fb   :  { %1644 = vpow2.f32 %v914_v11  ;;  %v910_v43 = vmul.f32 1.442695, %v885_v7 }
 0x201   :  { %v1645_v46 = vpop.eup %1644 }
 0x202   :  { %v935_v47 = vmul.f32 %v1645_v46, %v2333_v51  ;;  %v772_v46 = vld [vmem:[#allocation3 + $0x40] sm:$0xff] }
 0x204   :  { %962 = vadd.xlane.f32.xlu0 %v935_v47 }
 0x20c   :  { %1163 = vadd.xlane.f32.xlu0 %v651_v32  ;;  %v829_v32 = vpop.permute.xlu0 %828 }
 0x214   :  { %v814_v53 = vpop.permute.xlu0 %813 }
 0x21d   :  { %v1084_v51 = vpop.xlane.xlu2 %1083 }
 0x21e   :  { %v1100_v48 = vadd.f32 %v1084_v51, %v1036_v40 }
 0x220   :  { %1116 = vst.msk [vmem:[#allocation4 + $0x78] sm:$0xff] %vm27_vm7, %v1100_v48 }
 0x225   :  { %v799_v56 = vpop.permute.xlu2 %798 }
 0x226   :  { %v876_v16 = vsub.f32 %v2107_v41, %v799_v56  ;;  %v874_v41 = vpop.permute.xlu0 %873  ;;  %v2786_v56 = vsub.f32 %v2423_v14, %v2429_v62  ;;  %v2787_v62 = vsub.f32 %v2425_v50, %v2432_v35 }
 0x228   :  { %v892_v58 = vmul.f32 1.442695, %v876_v16  ;;  %v742_v16 = vmul.f32 1.442695, %v2786_v56 }
 0x22a   :  { %1646 = vpow2.f32 %v892_v58 }
 0x22b   :  { %1648 = vpow2.f32 %v748_v8  ;;  %v736_v8 = vmul.f32 1.442695, %v2787_v62  ;;  %v764_v62 = vld [vmem:[#allocation3] sm:$0xff] }
 0x22c   :  { %1650 = vpow2.f32 %v916_v3 }
 0x22d   :  { %v819_v27 = vpop.permute.xlu2 %818 }
 0x22e   :  { %v880_v22 = vsub.f32 %v2109_v42, %v819_v27  ;;  %v882_v42 = vsub.f32 %v2174_v26, %v829_v32 }
 0x230   :  { %v1647_v12 = vpop.eup %1646  ;;  %v900_v11 = vmul.f32 1.442695, %v880_v22  ;;  %v904_v30 = vmul.f32 1.442695, %v882_v42  ;;  %v778_v42 = vld [vmem:[#allocation3 + $0x70] sm:$0xff] }
 0x231   :  { %v924_v54 = vmul.f32 %v1647_v12, %v1951_v20  ;;  %v1649_v25 = vpop.eup %1648 }
 0x232   :  { %1652 = vpow2.f32 %v900_v11  ;;  %v1651_v40 = vpop.eup %1650  ;;  %v788_v2 = vmul.f32 %v1649_v25, %v772_v46 }
 0x233   :  { %940 = vadd.xlane.f32.xlu2 %v924_v54  ;;  %1654 = vpow2.f32 %v894_v37  ;;  %v936_v20 = vmul.f32 %v1651_v40, %v2137_v13  ;;  %v2788_v54 = vsub.f32 %v2459_v61, %v2467_v57 }
 0x234   :  { %1656 = vpow2.f32 %v910_v43  ;;  %v766_v43 = vld [vmem:[#allocation3 + $0x10] sm:$0xff] }
 0x235   :  { %v864_v47 = vpop.permute.xlu2 %863  ;;  %1658 = vpow2.f32 %v742_v16  ;;  %v760_v37 = vmul.f32 1.442695, %v2788_v54  ;;  %v775_v16 = vld [vmem:[#allocation3 + $0x58] sm:$0xff] }
 0x236   :  { %v889_v4 = vsub.f32 %v2198_v36, %v864_v47  ;;  %1660 = vpow2.f32 %v904_v30  ;;  %v879_v36 = vsub.f32 %v2286_v18, %v814_v53 }
 0x237   :  { %v957_v34 = vpop.xlane.xlu0 %956 }
 0x238   :  { %v1653_v39 = vpop.eup %1652  ;;  %v980_v51 = vadd.f32 %v957_v34, %v788_v2  ;;  %v918_v26 = vmul.f32 1.442695, %v889_v4  ;;  %v898_v3 = vmul.f32 1.442695, %v879_v36  ;;  %v2791_v36 = vld [vmem:[#allocation7_spill] sm:$0xff] }
 0x239   :  { %v928_v48 = vmul.f32 %v1653_v39, %v1978_v31  ;;  %v1655_v32 = vpop.eup %1654 }
 0x23a   :  { %997 = vst.msk [vmem:[#allocation3 + $0x40] sm:$0xff] %vm27_vm7, %v980_v51  ;;  %v1657_v21 = vpop.eup %1656  ;;  %1662 = vpow2.f32 %v918_v26  ;;  %v925_v14 = vmul.f32 %v1655_v32, %v1924_v5 }
 0x23b   :  { %964 = vadd.xlane.f32.xlu2 %v936_v20  ;;  %948 = vadd.xlane.f32.xlu1 %v928_v48  ;;  %v933_v13 = vmul.f32 %v1657_v21, %v2093_v29  ;;  %v1659_v27 = vpop.eup %1658  ;;  %1664 = vpow2.f32 %v736_v8  ;;  %v2790_v21 = vld [vmem:[#allocation6_spill] sm:$0xff] }
 0x23c   :  { %v1661_v12 = vpop.eup %1660  ;;  %1666 = vpow2.f32 %v898_v3  ;;  %v785_v29 = vmul.f32 %v1659_v27, %v769_v44  ;;  %v2793_v27 = vld [vmem:[#allocation8_spill] sm:$0xff] }
 0x23d   :  { %v849_v58 = vpop.permute.xlu2 %848  ;;  %v930_v35 = vmul.f32 %v1661_v12, %v2045_v6  ;;  %v2796_v12 = vld [vmem:[#allocation9_spill] sm:$0xff] }
 0x23e   :  { %v886_v31 = vsub.f32 %v2225_v52, %v849_v58  ;;  %v891_v52 = vsub.f32 %v2324_v10, %v874_v41 }
 0x240   :  { %v912_v22 = vmul.f32 1.442695, %v886_v31  ;;  %v1663_v18 = vpop.eup %1662  ;;  %v922_v25 = vmul.f32 1.442695, %v891_v52  ;;  %v2792_v31 = vsub.f32 %v2790_v21, %v2791_v36 }
 0x241   :  { %v937_v11 = vmul.f32 %v1663_v18, %v2221_v49  ;;  %v1665_v10 = vpop.eup %1664 }
 0x242   :  { %1668 = vpow2.f32 %v912_v22  ;;  %v1667_v46 = vpop.eup %1666  ;;  %v782_v47 = vmul.f32 %v1665_v10, %v766_v43  ;;  %v2794_v22 = vld [vmem:[#allocation10_spill] sm:$0xff]  ;;  %v2801_v10 = vld [vmem:[#allocation13_spill] sm:$0xff] }
 0x243   :  { %958 = vadd.xlane.f32.xlu2 %v933_v13  ;;  %942 = vadd.xlane.f32.xlu1 %v925_v14  ;;  %1670 = vpow2.f32 %v760_v37  ;;  %v927_v40 = vmul.f32 %v1667_v46, %v1988_v38  ;;  %v2789_v38 = vsub.f32 %v2501_v45, %v2511_v15  ;;  %v720_v45 = vsub.f32 %v2376_v24, %v2383_v19 }
 0x244   :  { %1672 = vpow2.f32 %v922_v25  ;;  %v756_v13 = vmul.f32 1.442695, %v2792_v31  ;;  %v2795_v44 = vsub.f32 %v2793_v27, %v2794_v22  ;;  %v2800_v25 = vld [vmem:[#allocation12_spill] sm:$0xff]  ;;  %v1328_v31 = vld [vmem:[#allocation4] sm:$0xff] }
 0x245   :  { %v834_v7 = vpop.permute.xlu2 %833  ;;  %v740_v15 = vmul.f32 1.442695, %v720_v45  ;;  %v777_v45 = vld [vmem:[#allocation3 + $0x68] sm:$0xff] }
 0x246   :  { %v883_v5 = vsub.f32 %v2288_v9, %v834_v7  ;;  %v2797_v7 = vld [vmem:[#allocation11_spill] sm:$0xff] }
 0x247   :  { %v951_v53 = vpop.xlane.xlu0 %950  ;;  %v2798_v24 = vsub.f32 %v2796_v12, %v2797_v7  ;;  %v2809_v12 = vld [vmem:[#allocation20_spill] sm:$0xff] }
 0x248   :  { %v977_v50 = vadd.f32 %v951_v53, %v785_v29  ;;  %v906_v41 = vmul.f32 1.442695, %v883_v5  ;;  %v1669_v9 = vpop.eup %1668  ;;  %v776_v29 = vld [vmem:[#allocation3 + $0x60] sm:$0xff] }
 0x249   :  { %v934_v57 = vmul.f32 %v1669_v9, %v2090_v28  ;;  %v1671_v61 = vpop.eup %1670  ;;  %v754_v28 = vmul.f32 1.442695, %v2789_v38  ;;  %v734_v19 = vmul.f32 1.442695, %v2798_v24  ;;  %v768_v5 = vld [vmem:[#allocation3 + $0x20] sm:$0xff] }
 0x24a   :  { %994 = vst.msk [vmem:[#allocation3 + $0x28] sm:$0xff] %vm27_vm7, %v977_v50  ;;  %1674 = vpow2.f32 %v906_v41  ;;  %v1673_v2 = vpop.eup %1672  ;;  %v794_v4 = vmul.f32 %v1671_v61, %v778_v42  ;;  %v2799_v53 = vld [vmem:[#allocation14_spill] sm:$0xff]  ;;  %v2802_v41 = vsub.f32 %v2800_v25, %v2801_v10  ;;  %v765_v61 = vld [vmem:[#allocation3 + $0x8] sm:$0xff] }
 0x24b   :  { %952 = vadd.xlane.f32.xlu2 %v930_v35  ;;  %966 = vadd.xlane.f32.xlu1 %v937_v11  ;;  %v939_v20 = vmul.f32 %v1673_v2, %v2542_v55  ;;  %1676 = vpow2.f32 %v754_v28  ;;  %v729_v50 = vsub.f32 %v2799_v53, %v2462_v60  ;;  %v773_v60 = vld [vmem:[#allocation3 + $0x48] sm:$0xff]  ;;  %v767_v53 = vld [vmem:[#allocation3 + $0x18] sm:$0xff] }
 0x24c   :  { %v744_v43 = vmul.f32 1.442695, %v2802_v41  ;;  %v2803_v42 = vld [vmem:[#allocation15_spill] sm:$0xff] }
 0x24d   :  { %v726_v2 = vsub.f32 %v2803_v42, %v2481_v33  ;;  %v1216_v33 = vld [vmem:[#allocation2] sm:$0xff] }
 0x24f   :  { %v945_v6 = vpop.xlane.xlu0 %944  ;;  %v752_v38 = vmul.f32 1.442695, %v726_v2 }
 0x250   :  { %v974_v49 = vadd.f32 %v945_v6, %v782_v47  ;;  %v1675_v39 = vpop.eup %1674  ;;  %v2696_v47 = vld [vmem:[#allocation5] sm:$0xff]  ;;  %v758_v6 = vmul.f32 1.442695, %v729_v50  ;;  %v774_v50 = vld [vmem:[#allocation3 + $0x50] sm:$0xff] }
 0x251   :  { %v931_v48 = vmul.f32 %v1675_v39, %v2039_v1  ;;  %v1677_v56 = vpop.eup %1676  ;;  %v1132_v1 = vld [vmem:[#allocation5 + $0x78] sm:$0xff]  ;;  %vm1296_vm0 = vcmp.gt.f32.partialorder %v2696_v47, 0.0 }
 0x252   :  { %991 = vst.msk [vmem:[#allocation3 + $0x10] sm:$0xff] %vm27_vm7, %v974_v49  ;;  %v791_v30 = vmul.f32 %v1677_v56, %v775_v16  ;;  %v2804_v16 = vld [vmem:[#allocation16_spill] sm:$0xff] }
 0x253   :  { %946 = vadd.xlane.f32.xlu2 %v927_v40  ;;  %960 = vadd.xlane.f32.xlu1 %v934_v57 }
 0x257   :  { %v969_v34 = vpop.xlane.xlu0 %968 }
 0x258   :  { %v986_v51 = vadd.f32 %v969_v34, %v794_v4  ;;  %v1312_v34 = vsel %vm1296_vm0, %v2696_v47, 1.0 }
 0x25a   :  { %1003 = vst.msk [vmem:[#allocation3 + $0x70] sm:$0xff] %vm27_vm7, %v986_v51 }
 0x25b   :  { %970 = vadd.xlane.f32.xlu2 %v939_v20  ;;  %954 = vadd.xlane.f32.xlu1 %v931_v48 }
 0x263   :  { %1159 = vadd.xlane.f32.xlu2 %v2238_v23  ;;  %1161 = vadd.xlane.f32.xlu1 %v2267_v63  ;;  %v716_v23 = vsub.f32 %v2367_v59, %v2370_v0  ;;  %v750_v59 = vmul.f32 1.442695, %v2795_v44 }
 0x265   :  { %v732_v63 = vmul.f32 1.442695, %v716_v23 }
 0x267   :  { %1678 = vpow2.f32 %v732_v63  ;;  %v770_v63 = vld [vmem:[#allocation3 + $0x30] sm:$0xff] }
 0x268   :  { %1680 = vpow2.f32 %v740_v15  ;;  %v2807_v15 = vld [vmem:[#allocation18_spill] sm:$0xff] }
 0x269   :  { %1682 = vpow2.f32 %v756_v13  ;;  %v723_v21 = vsub.f32 %v2807_v15, %v2506_v17  ;;  %v1201_v17 = vld [vmem:[#allocation5 + $0x8] sm:$0xff] }
 0x26a   :  { %1684 = vpow2.f32 %v750_v59  ;;  %vm1297_vm5 = vcmp.gt.f32.partialorder %v1201_v17, 0.0 }
 0x26b   :  { %1686 = vpow2.f32 %v734_v19  ;;  %v746_v22 = vmul.f32 1.442695, %v723_v21  ;;  %v1313_v10 = vsel %vm1297_vm5, %v1201_v17, 1.0 }
 0x26d   :  { %v1679_v14 = vpop.eup %1678 }
 0x26e   :  { %v780_v8 = vmul.f32 %v1679_v14, %v764_v62  ;;  %v1681_v18 = vpop.eup %1680 }
 0x26f   :  { %v1683_v52 = vpop.eup %1682  ;;  %v784_v11 = vmul.f32 %v1681_v18, %v768_v5 }
 0x270   :  { %v792_v35 = vmul.f32 %v1683_v52, %v776_v29  ;;  %v1685_v40 = vpop.eup %1684 }
 0x271   :  { %v1687_v57 = vpop.eup %1686  ;;  %v789_v39 = vmul.f32 %v1685_v40, %v773_v60  ;;  %v779_v40 = vld [vmem:[#allocation3 + $0x78] sm:$0xff] }
 0x272   :  { %v781_v4 = vmul.f32 %v1687_v57, %v765_v61  ;;  %v771_v57 = vld [vmem:[#allocation3 + $0x38] sm:$0xff] }
 0x277   :  { %v963_v26 = vpop.xlane.xlu0 %962 }
 0x278   :  { %v983_v55 = vadd.f32 %v963_v26, %v791_v30  ;;  %v2805_v30 = vld [vmem:[#allocation17_spill] sm:$0xff] }
 0x279   :  { %v2806_v26 = vsub.f32 %v2804_v16, %v2805_v30  ;;  %v1130_v16 = vld [vmem:[#allocation5 + $0x68] sm:$0xff]  ;;  %v1131_v30 = vld [vmem:[#allocation5 + $0x70] sm:$0xff] }
 0x27a   :  { %1000 = vst.msk [vmem:[#allocation3 + $0x58] sm:$0xff] %vm27_vm7, %v983_v55 }
 0x27b   :  { %v738_v55 = vmul.f32 1.442695, %v2806_v26 }
 0x27f   :  { %v1164_v32 = vpop.xlane.xlu0 %1163 }
 0x280   :  { %v1180_v58 = vadd.f32 %v1164_v32, %v1132_v1 }
 0x282   :  { %1196 = vst.msk [vmem:[#allocation5 + $0x78] sm:$0xff] %vm27_vm7, %v1180_v58 }
 0x2a6   :  { %v941_v3 = vpop.xlane.xlu2 %940 }
 0x2a7   :  { %v972_v0 = vadd.f32 %v941_v3, %v780_v8 }
 0x2a9   :  { %989 = vst.msk [vmem:[#allocation3] sm:$0xff] %vm27_vm7, %v972_v0  ;;  %v2808_v0 = vld [vmem:[#allocation19_spill] sm:$0xff] }
 0x2aa   :  { %v2810_v7 = vsub.f32 %v2808_v0, %v2809_v12 }
 0x2ac   :  { %v762_v24 = vmul.f32 1.442695, %v2810_v7 }
 0x2ae   :  { %v965_v54 = vpop.xlane.xlu2 %964  ;;  %v949_v37 = vpop.xlane.xlu1 %948 }
 0x2af   :  { %v984_v46 = vadd.f32 %v965_v54, %v792_v35  ;;  %v976_v9 = vadd.f32 %v949_v37, %v784_v11 }
 0x2b0   :  { %v1232_v49 = vld [vmem:[#allocation3] sm:$0xff] }
 0x2b1   :  { %1688 = vlog2.f32 %v1232_v49  ;;  %1001 = vst.msk [vmem:[#allocation3 + $0x60] sm:$0xff] %vm27_vm7, %v984_v46  ;;  %v1217_v49 = vld [vmem:[#allocation2 + $0x8] sm:$0xff] }
 0x2b2   :  { %993 = vst.msk [vmem:[#allocation3 + $0x20] sm:$0xff] %vm27_vm7, %v976_v9  ;;  %1690 = vpow2.f32 %v744_v43 }
 0x2b3   :  { %1692 = vpow2.f32 %v758_v6 }
 0x2b4   :  { %1694 = vrcp.f32 %v1312_v34 }
 0x2b5   :  { %1696 = vpow2.f32 %v752_v38 }
 0x2b6   :  { %v959_v51 = vpop.xlane.xlu2 %958  ;;  %v943_v20 = vpop.xlane.xlu1 %942  ;;  %1698 = vpow2.f32 %v738_v55 }
 0x2b7   :  { %v1689_v48 = vpop.eup %1688  ;;  %v981_v28 = vadd.f32 %v959_v51, %v789_v39  ;;  %v973_v56 = vadd.f32 %v943_v20, %v781_v4  ;;  %v1329_v39 = vld [vmem:[#allocation4 + $0x8] sm:$0xff] }
 0x2b8   :  { %v1249_v1 = vmul.f32 0.6931472, %v1689_v48  ;;  %v1691_v32 = vpop.eup %1690 }
 0x2b9   :  { %998 = vst.msk [vmem:[#allocation3 + $0x48] sm:$0xff] %vm27_vm7, %v981_v28  ;;  %v1693_v58 = vpop.eup %1692  ;;  %v786_v13 = vmul.f32 %v1691_v32, %v770_v63 }
 0x2ba   :  { %v1280_v23 = vadd.f32 %v1249_v1, %v1216_v33  ;;  %990 = vst.msk [vmem:[#allocation3 + $0x8] sm:$0xff] %vm27_vm7, %v973_v56  ;;  %v793_v14 = vmul.f32 %v1693_v58, %v777_v45  ;;  %v1695_v27 = vpop.eup %1694 }
 0x2bb   :  { %v1697_v18 = vpop.eup %1696 }
 0x2bc   :  { %v1344_v36 = vmul.f32 %v1280_v23, %v2696_v47  ;;  %v1699_v29 = vpop.eup %1698  ;;  %v790_v54 = vmul.f32 %v1697_v18, %v774_v50 }
 0x2bd   :  { %v783_v11 = vmul.f32 %v1699_v29, %v767_v53 }
 0x2be   :  { %v1360_v62 = vsub.f32 %v1328_v31, %v1344_v36  ;;  %v953_v8 = vpop.xlane.xlu2 %952  ;;  %v967_v3 = vpop.xlane.xlu1 %966 }
 0x2bf   :  { %v978_v44 = vadd.f32 %v953_v8, %v786_v13  ;;  %v985_v59 = vadd.f32 %v967_v3, %v793_v14 }
 0x2c0   :  { %v1392_v19 = vmul.f32 %v1695_v27, %v1360_v62 }
 0x2c1   :  { %v1233_v52 = vld [vmem:[#allocation3 + $0x8] sm:$0xff]  ;;  %995 = vst.msk [vmem:[#allocation3 + $0x30] sm:$0xff] %vm27_vm7, %v978_v44 }
 0x2c2   :  { %v1440_v5 = vmul.f32 -1.0, %v1392_v19  ;;  %1700 = vlog2.f32 %v1233_v52  ;;  %1002 = vst.msk [vmem:[#allocation3 + $0x68] sm:$0xff] %vm27_vm7, %v985_v59 }
 0x2c3   :  { %1702 = vpow2.f32 %v746_v22 }
 0x2c4   :  { %1704 = vpow2.f32 %v762_v24  ;;  %v1456_v35 = vsel %vm1296_vm0, %v1440_v5, 0.0 }
 0x2c5   :  { %1472 = vst.msk [vmem:[%s2743_s6] sm:$0xff] %vm27_vm7, %v1456_v35  ;;  %1706 = vrcp.f32 %v1313_v10 }
 0x2c6   :  { %v947_v37 = vpop.xlane.xlu2 %946  ;;  %v961_v25 = vpop.xlane.xlu1 %960 }
 0x2c7   :  { %v975_v41 = vadd.f32 %v947_v37, %v783_v11  ;;  %v982_v43 = vadd.f32 %v961_v25, %v790_v54 }
 0x2c8   :  { %v1701_v46 = vpop.eup %1700 }
 0x2c9   :  { %v1703_v9 = vpop.eup %1702  ;;  %v1251_v6 = vmul.f32 0.6931472, %v1701_v46  ;;  %992 = vst.msk [vmem:[#allocation3 + $0x18] sm:$0xff] %vm27_vm7, %v975_v41 }
 0x2ca   :  { %v1705_v47 = vpop.eup %1704  ;;  %999 = vst.msk [vmem:[#allocation3 + $0x50] sm:$0xff] %vm27_vm7, %v982_v43  ;;  %v787_v2 = vmul.f32 %v1703_v9, %v771_v57 }
 0x2cb   :  { %v1281_v60 = vadd.f32 %v1251_v6, %v1217_v49  ;;  %v795_v42 = vmul.f32 %v1705_v47, %v779_v40  ;;  %v1707_v38 = vpop.eup %1706 }
 0x2cd   :  { %v1345_v61 = vmul.f32 %v1281_v60, %v1201_v17 }
 0x2ce   :  { %v971_v4 = vpop.xlane.xlu2 %970  ;;  %v955_v34 = vpop.xlane.xlu1 %954 }
 0x2cf   :  { %v1361_v51 = vsub.f32 %v1329_v39, %v1345_v61  ;;  %v987_v20 = vadd.f32 %v971_v4, %v795_v42  ;;  %v979_v48 = vadd.f32 %v955_v34, %v787_v2 }
 0x2d1   :  { %v1393_v28 = vmul.f32 %v1707_v38, %v1361_v51  ;;  %1004 = vst.msk [vmem:[#allocation3 + $0x78] sm:$0xff] %vm27_vm7, %v987_v20 }
 0x2d2   :  { %996 = vst.msk [vmem:[#allocation3 + $0x38] sm:$0xff] %vm27_vm7, %v979_v48 }
 0x2d3   :  { %v1441_v56 = vmul.f32 -1.0, %v1393_v28 }
 0x2d5   :  { %v1457_v26 = vsel %vm1297_vm5, %v1441_v56, 0.0 }
 0x2d6   :  { %1473 = vst.msk [vmem:[%s2743_s6 + $0x8] sm:$0xff] %vm27_vm7, %v1457_v26  ;;  %v1160_v55 = vpop.xlane.xlu2 %1159  ;;  %v1162_v1 = vpop.xlane.xlu1 %1161 }
 0x2d7   :  { %v1178_v32 = vadd.f32 %v1160_v55, %v1130_v16  ;;  %v1179_v33 = vadd.f32 %v1162_v1, %v1131_v30 }
 0x2d9   :  { %1194 = vst.msk [vmem:[#allocation5 + $0x68] sm:$0xff] %vm27_vm7, %v1178_v32 }
 0x2da   :  { %1195 = vst.msk [vmem:[#allocation5 + $0x70] sm:$0xff] %vm27_vm7, %v1179_v33 }

</bundles_post_ra>
